<compile_context>
chip_gen: v6e
topology: v6e:2x2x1
jax: 0.10.0
libtpu: 0.0.40
codegen_flags: <defaults>
</compile_context>

<pallas_src>
import jax
import jax.numpy as jnp
from jax import lax
from jax.experimental import pallas as pl
from jax.experimental.pallas import tpu as pltpu

INPUT_SIZE = 4
HIDDEN = 32
OUT_DIM = 3
OUT_PAD = 128      # lane-dense fc output width inside the kernel (sliced back to 3 in the wrapper)


def _lstm_fc_kernel(x_ref, len_ref, w_ih_ref, w_hh_ref, b_ref, w_fc_ref, b_fc_ref, out_ref):
    """Whole forward in one invocation: hoisted input projection (kept as a value), fully
    unrolled time loop, single full-vreg gate tanh per step, fc fused per step."""
    B, T, I = x_ref.shape
    H = HIDDEN
    G = 4 * H

    # ---- hoisted weight / bias loads (live across the unrolled loop)
    w_ih = w_ih_ref[...]        # (I, 4H)
    w_hh = w_hh_ref[...]        # (H, 4H)
    b = b_ref[...]              # (1, 4H)  = b_ih + b_hh
    w_fc = w_fc_ref[...]        # (H, OUT_PAD)
    b_fc = b_fc_ref[...]        # (1, OUT_PAD)

    # ---- build the (B, 1) length column in-kernel from the raw SMEM scalars (B tiny & static)
    row = lax.broadcasted_iota(jnp.int32, (B, 1), 0)
    len_col = jnp.zeros((B, 1), jnp.int32)
    for bi in range(B):
        len_col = jnp.where(row == bi, len_ref[bi], len_col)

    # ---- hoisted input projection for ALL (b, t) rows, kept in registers (no scratch roundtrip)
    x_all = x_ref[...].reshape(B * T, I)                                   # layout-free reshape
    xw_all = jnp.dot(x_all, w_ih, preferred_element_type=jnp.float32) + b  # (B*T, 4H)
    xw_bt = xw_all.reshape(B, T, G)

    # ---- per-lane constants so all four gate nonlinearities are one full-vreg tanh:
    #      sigmoid(x) = 0.5 * (1 + tanh(x / 2));   lanes [2H, 3H) (the g gate) use plain tanh.
    lane = lax.broadcasted_iota(jnp.int32, (1, G), 1)
    is_tanh_lane = (lane >= 2 * H) & (lane < 3 * H)
    pre = jnp.where(is_tanh_lane, 1.0, 0.5).astype(jnp.float32)            # x-prescale
    post_mul = pre                                                         # same 0.5 / 1.0 pattern
    post_add = jnp.where(is_tanh_lane, 0.0, 0.5).astype(jnp.float32)

    h = jnp.zeros((B, H), jnp.float32)
    c = jnp.zeros((B, H), jnp.float32)

    # ---- fully unrolled time loop (T is small & static); only the h @ w_hh dot sits on the
    #      serial h->h chain, everything else overlaps.
    for t in range(T):
        gates = xw_bt[:, t, :] + jnp.dot(h, w_hh, preferred_element_type=jnp.float32)  # (B, 4H)
        act = jnp.tanh(gates * pre) * post_mul + post_add      # i|f|g|o activated in one EUP pass
        i_g = act[:, 0 * H:1 * H]
        f_g = act[:, 1 * H:2 * H]
        g_g = act[:, 2 * H:3 * H]
        o_g = act[:, 3 * H:4 * H]
        c_new = f_g * c + i_g * g_g
        h_new = o_g * jnp.tanh(c_new)

        m = len_col > t                                        # (B, 1): valid while t < lengths[b]
        h_out = jnp.where(m, h_new, 0.0)                       # zero-padded LSTM output this step
        # fused fc: off the h->h critical path; lane-dense 128-wide store
        out_ref[:, t, :] = (jnp.dot(h_out, w_fc, preferred_element_type=jnp.float32) + b_fc)
        h = jnp.where(m, h_new, h)                             # carry only where still valid
        c = jnp.where(m, c_new, c)


@jax.jit
def simple_rnn_forward(x, lengths, w_ih_t, w_hh_t, b_lstm, w_fc_p, b_fc_p):
    """x: (B, T, 4) f32, lengths: (B,) int32. Returns (B, T, 3) f32."""
    B, T, I = x.shape
    vmem = pltpu.MemorySpace.VMEM
    smem = pltpu.MemorySpace.SMEM

    out = pl.pallas_call(
        _lstm_fc_kernel,
        out_shape=jax.ShapeDtypeStruct((B, T, OUT_PAD), jnp.float32),
        in_specs=[
            pl.BlockSpec(memory_space=vmem),   # x            (B, T, I)
            pl.BlockSpec(memory_space=smem),   # lengths      (B,) int32 scalars
            pl.BlockSpec(memory_space=vmem),   # w_ih_t       (I, 4H)
            pl.BlockSpec(memory_space=vmem),   # w_hh_t       (H, 4H)
            pl.BlockSpec(memory_space=vmem),   # b_lstm       (1, 4H)
            pl.BlockSpec(memory_space=vmem),   # w_fc_p       (H, OUT_PAD)
            pl.BlockSpec(memory_space=vmem),   # b_fc_p       (1, OUT_PAD)
        ],
        out_specs=pl.BlockSpec(memory_space=vmem),
    )(x, lengths, w_ih_t, w_hh_t, b_lstm, w_fc_p, b_fc_p)

    return out[:, :, :OUT_DIM]                 # the single wrapper-side XLA op


def _ref_forward(x, lengths, w_ih_t, w_hh_t, b_lstm, w_fc_p, b_fc_p):
    """Pure-JAX reference with identical semantics (for verification)."""
    B, T, _ = x.shape
    H = HIDDEN
    w_fc = w_fc_p[:, :OUT_DIM]
    b_fc = b_fc_p[:, :OUT_DIM]
    h = jnp.zeros((B, H), jnp.float32)
    c = jnp.zeros((B, H), jnp.float32)
    outs = []
    for t in range(T):
        g = x[:, t] @ w_ih_t + h @ w_hh_t + b_lstm
        i_g = jax.nn.sigmoid(g[:, :H])
        f_g = jax.nn.sigmoid(g[:, H:2 * H])
        g_g = jnp.tanh(g[:, 2 * H:3 * H])
        o_g = jax.nn.sigmoid(g[:, 3 * H:])
        c_new = f_g * c + i_g * g_g
        h_new = o_g * jnp.tanh(c_new)
        m = (t < lengths)[:, None]
        c = jnp.where(m, c_new, c)
        h = jnp.where(m, h_new, h)
        outs.append(jnp.where(m, h_new, 0.0) @ w_fc + b_fc)
    return jnp.stack(outs, axis=1)


def init_params(key):
    """Deterministic init mirroring PyTorch defaults: U(-1/sqrt(H), 1/sqrt(H)).
    Returns kernel-layout params; the fc is padded to 128 output lanes ONCE here (outside jit)."""
    k = 1.0 / jnp.sqrt(jnp.float32(HIDDEN))
    ks = jax.random.split(key, 6)
    # PyTorch stores weight_ih_l0 as (4H, I); we pass the transpose so gates = x @ W_ih^T.
    w_ih_t = jax.random.uniform(ks[0], (INPUT_SIZE, 4 * HIDDEN), jnp.float32, -k, k)
    w_hh_t = jax.random.uniform(ks[1], (HIDDEN, 4 * HIDDEN), jnp.float32, -k, k)
    b_ih = jax.random.uniform(ks[2], (4 * HIDDEN,), jnp.float32, -k, k)
    b_hh = jax.random.uniform(ks[3], (4 * HIDDEN,), jnp.float32, -k, k)
    b_lstm = (b_ih + b_hh).reshape(1, 4 * HIDDEN)
    w_fc = jax.random.uniform(ks[4], (HIDDEN, OUT_DIM), jnp.float32, -k, k)
    b_fc = jax.random.uniform(ks[5], (1, OUT_DIM), jnp.float32, -k, k)
    w_fc_p = jnp.zeros((HIDDEN, OUT_PAD), jnp.float32).at[:, :OUT_DIM].set(w_fc)
    b_fc_p = jnp.zeros((1, OUT_PAD), jnp.float32).at[:, :OUT_DIM].set(b_fc)
    return w_ih_t, w_hh_t, b_lstm, w_fc_p, b_fc_p


if __name__ == "__main__":
    key = jax.random.PRNGKey(0)
    k_x, k_p = jax.random.split(key)

    B, T = 4, 8
    x = jax.random.normal(k_x, (B, T, INPUT_SIZE), jnp.float32)
    lengths = jnp.array([8, 5, 3, 7], dtype=jnp.int32)   # max(lengths) == T

    params = init_params(k_p)

    out = simple_rnn_forward(x, lengths, *params)
    out = jax.block_until_ready(out)
    assert out.shape == (B, T, OUT_DIM), out.shape

    ref = jax.block_until_ready(_ref_forward(x, lengths, *params))
    assert jnp.allclose(out, ref, rtol=1e-4, atol=1e-4), float(jnp.max(jnp.abs(out - ref)))

    print("KERNEL_OK")
</pallas_src>

<mosaic_0001>
module attributes {stable_mosaic.version = 11 : i64} {
  func.func @_lstm_fc_kernel(%arg0: memref<4x8x4xf32, #tpu.memory_space<vmem>>, %arg1: memref<4xi32, #tpu.memory_space<smem>>, %arg2: memref<4x128xf32, #tpu.memory_space<vmem>>, %arg3: memref<32x128xf32, #tpu.memory_space<vmem>>, %arg4: memref<1x128xf32, #tpu.memory_space<vmem>>, %arg5: memref<32x128xf32, #tpu.memory_space<vmem>>, %arg6: memref<1x128xf32, #tpu.memory_space<vmem>>, %arg7: memref<4x8x128xf32, #tpu.memory_space<vmem>>) attributes {dimension_semantics = [], scalar_prefetch = 0 : i64, scratch_operands = 0 : i64, tpu.core_type = #tpu.core_type<tc>} {
    %c0 = arith.constant 0 : index
    %c0_0 = arith.constant 0 : index
    %0 = vector.load %arg2[%c0, %c0_0] : memref<4x128xf32, #tpu.memory_space<vmem>>, vector<4x128xf32>
    %c0_1 = arith.constant 0 : index
    %c0_2 = arith.constant 0 : index
    %1 = vector.load %arg3[%c0_1, %c0_2] : memref<32x128xf32, #tpu.memory_space<vmem>>, vector<32x128xf32>
    %c0_3 = arith.constant 0 : index
    %c0_4 = arith.constant 0 : index
    %2 = vector.load %arg4[%c0_3, %c0_4] : memref<1x128xf32, #tpu.memory_space<vmem>>, vector<1x128xf32>
    %c0_5 = arith.constant 0 : index
    %c0_6 = arith.constant 0 : index
    %3 = vector.load %arg5[%c0_5, %c0_6] : memref<32x128xf32, #tpu.memory_space<vmem>>, vector<32x128xf32>
    %c0_7 = arith.constant 0 : index
    %c0_8 = arith.constant 0 : index
    %4 = vector.load %arg6[%c0_7, %c0_8] : memref<1x128xf32, #tpu.memory_space<vmem>>, vector<1x128xf32>
    %5 = tpu.iota {dimensions = array<i32: 0>} : vector<4x1xi32>
    %c0_i32 = arith.constant 0 : i32
    %6 = vector.broadcast %c0_i32 : i32 to vector<4x1xi32>
    %c0_i32_9 = arith.constant 0 : i32
    %7 = vector.broadcast %c0_i32_9 : i32 to vector<4x1xi32>
    %8 = arith.cmpi eq, %5, %7 : vector<4x1xi32>
    %c0_10 = arith.constant 0 : index
    %9 = memref.load %arg1[%c0_10] : memref<4xi32, #tpu.memory_space<smem>>
    %10 = vector.broadcast %9 : i32 to vector<4x1xi32>
    %11 = arith.select %8, %10, %6 : vector<4x1xi1>, vector<4x1xi32>
    %c1_i32 = arith.constant 1 : i32
    %12 = vector.broadcast %c1_i32 : i32 to vector<4x1xi32>
    %13 = arith.cmpi eq, %5, %12 : vector<4x1xi32>
    %c1 = arith.constant 1 : index
    %14 = memref.load %arg1[%c1] : memref<4xi32, #tpu.memory_space<smem>>
    %15 = vector.broadcast %14 : i32 to vector<4x1xi32>
    %16 = arith.select %13, %15, %11 : vector<4x1xi1>, vector<4x1xi32>
    %c2_i32 = arith.constant 2 : i32
    %17 = vector.broadcast %c2_i32 : i32 to vector<4x1xi32>
    %18 = arith.cmpi eq, %5, %17 : vector<4x1xi32>
    %c2 = arith.constant 2 : index
    %19 = memref.load %arg1[%c2] : memref<4xi32, #tpu.memory_space<smem>>
    %20 = vector.broadcast %19 : i32 to vector<4x1xi32>
    %21 = arith.select %18, %20, %16 : vector<4x1xi1>, vector<4x1xi32>
    %c3_i32 = arith.constant 3 : i32
    %22 = vector.broadcast %c3_i32 : i32 to vector<4x1xi32>
    %23 = arith.cmpi eq, %5, %22 : vector<4x1xi32>
    %c3 = arith.constant 3 : index
    %24 = memref.load %arg1[%c3] : memref<4xi32, #tpu.memory_space<smem>>
    %25 = vector.broadcast %24 : i32 to vector<4x1xi32>
    %26 = arith.select %23, %25, %21 : vector<4x1xi1>, vector<4x1xi32>
    %c0_11 = arith.constant 0 : index
    %c0_12 = arith.constant 0 : index
    %c0_13 = arith.constant 0 : index
    %27 = vector.load %arg0[%c0_11, %c0_12, %c0_13] : memref<4x8x4xf32, #tpu.memory_space<vmem>>, vector<4x8x4xf32>
    %28 = vector.shape_cast %27 : vector<4x8x4xf32> to vector<32x4xf32>
    %cst = arith.constant dense<0.000000e+00> : vector<32x128xf32>
    %29 = tpu.matmul %28, %0, %cst {dimension_numbers = #tpu.dot_dimension_numbers<[1], [0], [0], [1], [0, 0, 1, 1], [], []>} : vector<32x4xf32>, vector<4x128xf32>, vector<32x128xf32> -> vector<32x128xf32>
    %30 = vector.broadcast %2 : vector<1x128xf32> to vector<32x128xf32>
    %31 = arith.addf %29, %30 : vector<32x128xf32>
    %32 = vector.shape_cast %31 : vector<32x128xf32> to vector<4x8x128xf32>
    %33 = tpu.iota {dimensions = array<i32: 1>} : vector<1x128xi32>
    %c64_i32 = arith.constant 64 : i32
    %34 = vector.broadcast %c64_i32 : i32 to vector<1x128xi32>
    %35 = arith.cmpi sge, %33, %34 : vector<1x128xi32>
    %c96_i32 = arith.constant 96 : i32
    %36 = vector.broadcast %c96_i32 : i32 to vector<1x128xi32>
    %37 = arith.cmpi slt, %33, %36 : vector<1x128xi32>
    %38 = arith.andi %35, %37 : vector<1x128xi1>
    %cst_14 = arith.constant 1.000000e+00 : f32
    %cst_15 = arith.constant 5.000000e-01 : f32
    %39 = vector.broadcast %cst_14 : f32 to vector<1x128xf32>
    %40 = vector.broadcast %cst_15 : f32 to vector<1x128xf32>
    %41 = arith.select %38, %39, %40 : vector<1x128xi1>, vector<1x128xf32>
    %cst_16 = arith.constant 0.000000e+00 : f32
    %cst_17 = arith.constant 5.000000e-01 : f32
    %42 = vector.broadcast %cst_16 : f32 to vector<1x128xf32>
    %43 = vector.broadcast %cst_17 : f32 to vector<1x128xf32>
    %44 = arith.select %38, %42, %43 : vector<1x128xi1>, vector<1x128xf32>
    %cst_18 = arith.constant 0.000000e+00 : f32
    %45 = vector.broadcast %cst_18 : f32 to vector<4x32xf32>
    %cst_19 = arith.constant 0.000000e+00 : f32
    %46 = vector.broadcast %cst_19 : f32 to vector<4x32xf32>
    %47 = vector.extract_strided_slice %32 {offsets = [0, 0, 0], sizes = [4, 1, 128], strides = [1, 1, 1]} : vector<4x8x128xf32> to vector<4x1x128xf32>
    %48 = vector.shape_cast %47 : vector<4x1x128xf32> to vector<4x128xf32>
    %cst_20 = arith.constant dense<0.000000e+00> : vector<4x128xf32>
    %49 = tpu.matmul %45, %1, %cst_20 {dimension_numbers = #tpu.dot_dimension_numbers<[1], [0], [0], [1], [0, 0, 1, 1], [], []>} : vector<4x32xf32>, vector<32x128xf32>, vector<4x128xf32> -> vector<4x128xf32>
    %50 = arith.addf %48, %49 : vector<4x128xf32>
    %51 = vector.broadcast %41 : vector<1x128xf32> to vector<4x128xf32>
    %52 = arith.mulf %50, %51 : vector<4x128xf32>
    %53 = math.tanh %52 : vector<4x128xf32>
    %54 = vector.broadcast %41 : vector<1x128xf32> to vector<4x128xf32>
    %55 = arith.mulf %53, %54 : vector<4x128xf32>
    %56 = vector.broadcast %44 : vector<1x128xf32> to vector<4x128xf32>
    %57 = arith.addf %55, %56 : vector<4x128xf32>
    %58 = vector.extract_strided_slice %57 {offsets = [0, 0], sizes = [4, 32], strides = [1, 1]} : vector<4x128xf32> to vector<4x32xf32>
    %59 = vector.extract_strided_slice %57 {offsets = [0, 32], sizes = [4, 32], strides = [1, 1]} : vector<4x128xf32> to vector<4x32xf32>
    %60 = vector.extract_strided_slice %57 {offsets = [0, 64], sizes = [4, 32], strides = [1, 1]} : vector<4x128xf32> to vector<4x32xf32>
    %61 = vector.extract_strided_slice %57 {offsets = [0, 96], sizes = [4, 32], strides = [1, 1]} : vector<4x128xf32> to vector<4x32xf32>
    %62 = arith.mulf %59, %46 : vector<4x32xf32>
    %63 = arith.mulf %58, %60 : vector<4x32xf32>
    %64 = arith.addf %62, %63 : vector<4x32xf32>
    %65 = math.tanh %64 : vector<4x32xf32>
    %66 = arith.mulf %61, %65 : vector<4x32xf32>
    %c0_i32_21 = arith.constant 0 : i32
    %67 = vector.broadcast %c0_i32_21 : i32 to vector<4x1xi32>
    %68 = arith.cmpi sgt, %26, %67 : vector<4x1xi32>
    %cst_22 = arith.constant 0.000000e+00 : f32
    %69 = vector.shape_cast %68 : vector<4x1xi1> to vector<4x1xi1>
    %70 = vector.broadcast %69 : vector<4x1xi1> to vector<4x32xi1>
    %71 = vector.broadcast %cst_22 : f32 to vector<4x32xf32>
    %72 = arith.select %70, %66, %71 : vector<4x32xi1>, vector<4x32xf32>
    %cst_23 = arith.constant dense<0.000000e+00> : vector<4x128xf32>
    %73 = tpu.matmul %72, %3, %cst_23 {dimension_numbers = #tpu.dot_dimension_numbers<[1], [0], [0], [1], [0, 0, 1, 1], [], []>} : vector<4x32xf32>, vector<32x128xf32>, vector<4x128xf32> -> vector<4x128xf32>
    %74 = vector.broadcast %4 : vector<1x128xf32> to vector<4x128xf32>
    %75 = arith.addf %73, %74 : vector<4x128xf32>
    %c0_24 = arith.constant 0 : index
    %c0_25 = arith.constant 0 : index
    %c0_26 = arith.constant 0 : index
    %76 = vector.load %arg7[%c0_24, %c0_25, %c0_26] : memref<4x8x128xf32, #tpu.memory_space<vmem>>, vector<4x1x128xf32>
    %77 = vector.shape_cast %76 : vector<4x1x128xf32> to vector<4x128xf32>
    %78 = vector.shape_cast %75 : vector<4x128xf32> to vector<4x1x128xf32>
    tpu.vector_store %arg7[%c0_24, %c0_25, %c0_26], %78 {strides = array<i32>} : memref<4x8x128xf32, #tpu.memory_space<vmem>>, vector<4x1x128xf32>,
    %79 = vector.shape_cast %68 : vector<4x1xi1> to vector<4x1xi1>
    %80 = vector.broadcast %79 : vector<4x1xi1> to vector<4x32xi1>
    %81 = arith.select %80, %66, %45 : vector<4x32xi1>, vector<4x32xf32>
    %82 = vector.shape_cast %68 : vector<4x1xi1> to vector<4x1xi1>
    %83 = vector.broadcast %82 : vector<4x1xi1> to vector<4x32xi1>
    %84 = arith.select %83, %64, %46 : vector<4x32xi1>, vector<4x32xf32>
    %85 = vector.extract_strided_slice %32 {offsets = [0, 1, 0], sizes = [4, 1, 128], strides = [1, 1, 1]} : vector<4x8x128xf32> to vector<4x1x128xf32>
    %86 = vector.shape_cast %85 : vector<4x1x128xf32> to vector<4x128xf32>
    %cst_27 = arith.constant dense<0.000000e+00> : vector<4x128xf32>
    %87 = tpu.matmul %81, %1, %cst_27 {dimension_numbers = #tpu.dot_dimension_numbers<[1], [0], [0], [1], [0, 0, 1, 1], [], []>} : vector<4x32xf32>, vector<32x128xf32>, vector<4x128xf32> -> vector<4x128xf32>
    %88 = arith.addf %86, %87 : vector<4x128xf32>
    %89 = vector.broadcast %41 : vector<1x128xf32> to vector<4x128xf32>
    %90 = arith.mulf %88, %89 : vector<4x128xf32>
    %91 = math.tanh %90 : vector<4x128xf32>
    %92 = vector.broadcast %41 : vector<1x128xf32> to vector<4x128xf32>
    %93 = arith.mulf %91, %92 : vector<4x128xf32>
    %94 = vector.broadcast %44 : vector<1x128xf32> to vector<4x128xf32>
    %95 = arith.addf %93, %94 : vector<4x128xf32>
    %96 = vector.extract_strided_slice %95 {offsets = [0, 0], sizes = [4, 32], strides = [1, 1]} : vector<4x128xf32> to vector<4x32xf32>
    %97 = vector.extract_strided_slice %95 {offsets = [0, 32], sizes = [4, 32], strides = [1, 1]} : vector<4x128xf32> to vector<4x32xf32>
    %98 = vector.extract_strided_slice %95 {offsets = [0, 64], sizes = [4, 32], strides = [1, 1]} : vector<4x128xf32> to vector<4x32xf32>
    %99 = vector.extract_strided_slice %95 {offsets = [0, 96], sizes = [4, 32], strides = [1, 1]} : vector<4x128xf32> to vector<4x32xf32>
    %100 = arith.mulf %97, %84 : vector<4x32xf32>
    %101 = arith.mulf %96, %98 : vector<4x32xf32>
    %102 = arith.addf %100, %101 : vector<4x32xf32>
    %103 = math.tanh %102 : vector<4x32xf32>
    %104 = arith.mulf %99, %103 : vector<4x32xf32>
    %c1_i32_28 = arith.constant 1 : i32
    %105 = vector.broadcast %c1_i32_28 : i32 to vector<4x1xi32>
    %106 = arith.cmpi sgt, %26, %105 : vector<4x1xi32>
    %cst_29 = arith.constant 0.000000e+00 : f32
    %107 = vector.shape_cast %106 : vector<4x1xi1> to vector<4x1xi1>
    %108 = vector.broadcast %107 : vector<4x1xi1> to vector<4x32xi1>
    %109 = vector.broadcast %cst_29 : f32 to vector<4x32xf32>
    %110 = arith.select %108, %104, %109 : vector<4x32xi1>, vector<4x32xf32>
    %cst_30 = arith.constant dense<0.000000e+00> : vector<4x128xf32>
    %111 = tpu.matmul %110, %3, %cst_30 {dimension_numbers = #tpu.dot_dimension_numbers<[1], [0], [0], [1], [0, 0, 1, 1], [], []>} : vector<4x32xf32>, vector<32x128xf32>, vector<4x128xf32> -> vector<4x128xf32>
    %112 = vector.broadcast %4 : vector<1x128xf32> to vector<4x128xf32>
    %113 = arith.addf %111, %112 : vector<4x128xf32>
    %c0_31 = arith.constant 0 : index
    %c1_32 = arith.constant 1 : index
    %c0_33 = arith.constant 0 : index
    %114 = vector.load %arg7[%c0_31, %c1_32, %c0_33] : memref<4x8x128xf32, #tpu.memory_space<vmem>>, vector<4x1x128xf32>
    %115 = vector.shape_cast %114 : vector<4x1x128xf32> to vector<4x128xf32>
    %116 = vector.shape_cast %113 : vector<4x128xf32> to vector<4x1x128xf32>
    tpu.vector_store %arg7[%c0_31, %c1_32, %c0_33], %116 {strides = array<i32>} : memref<4x8x128xf32, #tpu.memory_space<vmem>>, vector<4x1x128xf32>,
    %117 = vector.shape_cast %106 : vector<4x1xi1> to vector<4x1xi1>
    %118 = vector.broadcast %117 : vector<4x1xi1> to vector<4x32xi1>
    %119 = arith.select %118, %104, %81 : vector<4x32xi1>, vector<4x32xf32>
    %120 = vector.shape_cast %106 : vector<4x1xi1> to vector<4x1xi1>
    %121 = vector.broadcast %120 : vector<4x1xi1> to vector<4x32xi1>
    %122 = arith.select %121, %102, %84 : vector<4x32xi1>, vector<4x32xf32>
    %123 = vector.extract_strided_slice %32 {offsets = [0, 2, 0], sizes = [4, 1, 128], strides = [1, 1, 1]} : vector<4x8x128xf32> to vector<4x1x128xf32>
    %124 = vector.shape_cast %123 : vector<4x1x128xf32> to vector<4x128xf32>
    %cst_34 = arith.constant dense<0.000000e+00> : vector<4x128xf32>
    %125 = tpu.matmul %119, %1, %cst_34 {dimension_numbers = #tpu.dot_dimension_numbers<[1], [0], [0], [1], [0, 0, 1, 1], [], []>} : vector<4x32xf32>, vector<32x128xf32>, vector<4x128xf32> -> vector<4x128xf32>
    %126 = arith.addf %124, %125 : vector<4x128xf32>
    %127 = vector.broadcast %41 : vector<1x128xf32> to vector<4x128xf32>
    %128 = arith.mulf %126, %127 : vector<4x128xf32>
    %129 = math.tanh %128 : vector<4x128xf32>
    %130 = vector.broadcast %41 : vector<1x128xf32> to vector<4x128xf32>
    %131 = arith.mulf %129, %130 : vector<4x128xf32>
    %132 = vector.broadcast %44 : vector<1x128xf32> to vector<4x128xf32>
    %133 = arith.addf %131, %132 : vector<4x128xf32>
    %134 = vector.extract_strided_slice %133 {offsets = [0, 0], sizes = [4, 32], strides = [1, 1]} : vector<4x128xf32> to vector<4x32xf32>
    %135 = vector.extract_strided_slice %133 {offsets = [0, 32], sizes = [4, 32], strides = [1, 1]} : vector<4x128xf32> to vector<4x32xf32>
    %136 = vector.extract_strided_slice %133 {offsets = [0, 64], sizes = [4, 32], strides = [1, 1]} : vector<4x128xf32> to vector<4x32xf32>
    %137 = vector.extract_strided_slice %133 {offsets = [0, 96], sizes = [4, 32], strides = [1, 1]} : vector<4x128xf32> to vector<4x32xf32>
    %138 = arith.mulf %135, %122 : vector<4x32xf32>
    %139 = arith.mulf %134, %136 : vector<4x32xf32>
    %140 = arith.addf %138, %139 : vector<4x32xf32>
    %141 = math.tanh %140 : vector<4x32xf32>
    %142 = arith.mulf %137, %141 : vector<4x32xf32>
    %c2_i32_35 = arith.constant 2 : i32
    %143 = vector.broadcast %c2_i32_35 : i32 to vector<4x1xi32>
    %144 = arith.cmpi sgt, %26, %143 : vector<4x1xi32>
    %cst_36 = arith.constant 0.000000e+00 : f32
    %145 = vector.shape_cast %144 : vector<4x1xi1> to vector<4x1xi1>
    %146 = vector.broadcast %145 : vector<4x1xi1> to vector<4x32xi1>
    %147 = vector.broadcast %cst_36 : f32 to vector<4x32xf32>
    %148 = arith.select %146, %142, %147 : vector<4x32xi1>, vector<4x32xf32>
    %cst_37 = arith.constant dense<0.000000e+00> : vector<4x128xf32>
    %149 = tpu.matmul %148, %3, %cst_37 {dimension_numbers = #tpu.dot_dimension_numbers<[1], [0], [0], [1], [0, 0, 1, 1], [], []>} : vector<4x32xf32>, vector<32x128xf32>, vector<4x128xf32> -> vector<4x128xf32>
    %150 = vector.broadcast %4 : vector<1x128xf32> to vector<4x128xf32>
    %151 = arith.addf %149, %150 : vector<4x128xf32>
    %c0_38 = arith.constant 0 : index
    %c2_39 = arith.constant 2 : index
    %c0_40 = arith.constant 0 : index
    %152 = vector.load %arg7[%c0_38, %c2_39, %c0_40] : memref<4x8x128xf32, #tpu.memory_space<vmem>>, vector<4x1x128xf32>
    %153 = vector.shape_cast %152 : vector<4x1x128xf32> to vector<4x128xf32>
    %154 = vector.shape_cast %151 : vector<4x128xf32> to vector<4x1x128xf32>
    tpu.vector_store %arg7[%c0_38, %c2_39, %c0_40], %154 {strides = array<i32>} : memref<4x8x128xf32, #tpu.memory_space<vmem>>, vector<4x1x128xf32>,
    %155 = vector.shape_cast %144 : vector<4x1xi1> to vector<4x1xi1>
    %156 = vector.broadcast %155 : vector<4x1xi1> to vector<4x32xi1>
    %157 = arith.select %156, %142, %119 : vector<4x32xi1>, vector<4x32xf32>
    %158 = vector.shape_cast %144 : vector<4x1xi1> to vector<4x1xi1>
    %159 = vector.broadcast %158 : vector<4x1xi1> to vector<4x32xi1>
    %160 = arith.select %159, %140, %122 : vector<4x32xi1>, vector<4x32xf32>
    %161 = vector.extract_strided_slice %32 {offsets = [0, 3, 0], sizes = [4, 1, 128], strides = [1, 1, 1]} : vector<4x8x128xf32> to vector<4x1x128xf32>
    %162 = vector.shape_cast %161 : vector<4x1x128xf32> to vector<4x128xf32>
    %cst_41 = arith.constant dense<0.000000e+00> : vector<4x128xf32>
    %163 = tpu.matmul %157, %1, %cst_41 {dimension_numbers = #tpu.dot_dimension_numbers<[1], [0], [0], [1], [0, 0, 1, 1], [], []>} : vector<4x32xf32>, vector<32x128xf32>, vector<4x128xf32> -> vector<4x128xf32>
    %164 = arith.addf %162, %163 : vector<4x128xf32>
    %165 = vector.broadcast %41 : vector<1x128xf32> to vector<4x128xf32>
    %166 = arith.mulf %164, %165 : vector<4x128xf32>
    %167 = math.tanh %166 : vector<4x128xf32>
    %168 = vector.broadcast %41 : vector<1x128xf32> to vector<4x128xf32>
    %169 = arith.mulf %167, %168 : vector<4x128xf32>
    %170 = vector.broadcast %44 : vector<1x128xf32> to vector<4x128xf32>
    %171 = arith.addf %169, %170 : vector<4x128xf32>
    %172 = vector.extract_strided_slice %171 {offsets = [0, 0], sizes = [4, 32], strides = [1, 1]} : vector<4x128xf32> to vector<4x32xf32>
    %173 = vector.extract_strided_slice %171 {offsets = [0, 32], sizes = [4, 32], strides = [1, 1]} : vector<4x128xf32> to vector<4x32xf32>
    %174 = vector.extract_strided_slice %171 {offsets = [0, 64], sizes = [4, 32], strides = [1, 1]} : vector<4x128xf32> to vector<4x32xf32>
    %175 = vector.extract_strided_slice %171 {offsets = [0, 96], sizes = [4, 32], strides = [1, 1]} : vector<4x128xf32> to vector<4x32xf32>
    %176 = arith.mulf %173, %160 : vector<4x32xf32>
    %177 = arith.mulf %172, %174 : vector<4x32xf32>
    %178 = arith.addf %176, %177 : vector<4x32xf32>
    %179 = math.tanh %178 : vector<4x32xf32>
    %180 = arith.mulf %175, %179 : vector<4x32xf32>
    %c3_i32_42 = arith.constant 3 : i32
    %181 = vector.broadcast %c3_i32_42 : i32 to vector<4x1xi32>
    %182 = arith.cmpi sgt, %26, %181 : vector<4x1xi32>
    %cst_43 = arith.constant 0.000000e+00 : f32
    %183 = vector.shape_cast %182 : vector<4x1xi1> to vector<4x1xi1>
    %184 = vector.broadcast %183 : vector<4x1xi1> to vector<4x32xi1>
    %185 = vector.broadcast %cst_43 : f32 to vector<4x32xf32>
    %186 = arith.select %184, %180, %185 : vector<4x32xi1>, vector<4x32xf32>
    %cst_44 = arith.constant dense<0.000000e+00> : vector<4x128xf32>
    %187 = tpu.matmul %186, %3, %cst_44 {dimension_numbers = #tpu.dot_dimension_numbers<[1], [0], [0], [1], [0, 0, 1, 1], [], []>} : vector<4x32xf32>, vector<32x128xf32>, vector<4x128xf32> -> vector<4x128xf32>
    %188 = vector.broadcast %4 : vector<1x128xf32> to vector<4x128xf32>
    %189 = arith.addf %187, %188 : vector<4x128xf32>
    %c0_45 = arith.constant 0 : index
    %c3_46 = arith.constant 3 : index
    %c0_47 = arith.constant 0 : index
    %190 = vector.load %arg7[%c0_45, %c3_46, %c0_47] : memref<4x8x128xf32, #tpu.memory_space<vmem>>, vector<4x1x128xf32>
    %191 = vector.shape_cast %190 : vector<4x1x128xf32> to vector<4x128xf32>
    %192 = vector.shape_cast %189 : vector<4x128xf32> to vector<4x1x128xf32>
    tpu.vector_store %arg7[%c0_45, %c3_46, %c0_47], %192 {strides = array<i32>} : memref<4x8x128xf32, #tpu.memory_space<vmem>>, vector<4x1x128xf32>,
    %193 = vector.shape_cast %182 : vector<4x1xi1> to vector<4x1xi1>
    %194 = vector.broadcast %193 : vector<4x1xi1> to vector<4x32xi1>
    %195 = arith.select %194, %180, %157 : vector<4x32xi1>, vector<4x32xf32>
    %196 = vector.shape_cast %182 : vector<4x1xi1> to vector<4x1xi1>
    %197 = vector.broadcast %196 : vector<4x1xi1> to vector<4x32xi1>
    %198 = arith.select %197, %178, %160 : vector<4x32xi1>, vector<4x32xf32>
    %199 = vector.extract_strided_slice %32 {offsets = [0, 4, 0], sizes = [4, 1, 128], strides = [1, 1, 1]} : vector<4x8x128xf32> to vector<4x1x128xf32>
    %200 = vector.shape_cast %199 : vector<4x1x128xf32> to vector<4x128xf32>
    %cst_48 = arith.constant dense<0.000000e+00> : vector<4x128xf32>
    %201 = tpu.matmul %195, %1, %cst_48 {dimension_numbers = #tpu.dot_dimension_numbers<[1], [0], [0], [1], [0, 0, 1, 1], [], []>} : vector<4x32xf32>, vector<32x128xf32>, vector<4x128xf32> -> vector<4x128xf32>
    %202 = arith.addf %200, %201 : vector<4x128xf32>
    %203 = vector.broadcast %41 : vector<1x128xf32> to vector<4x128xf32>
    %204 = arith.mulf %202, %203 : vector<4x128xf32>
    %205 = math.tanh %204 : vector<4x128xf32>
    %206 = vector.broadcast %41 : vector<1x128xf32> to vector<4x128xf32>
    %207 = arith.mulf %205, %206 : vector<4x128xf32>
    %208 = vector.broadcast %44 : vector<1x128xf32> to vector<4x128xf32>
    %209 = arith.addf %207, %208 : vector<4x128xf32>
    %210 = vector.extract_strided_slice %209 {offsets = [0, 0], sizes = [4, 32], strides = [1, 1]} : vector<4x128xf32> to vector<4x32xf32>
    %211 = vector.extract_strided_slice %209 {offsets = [0, 32], sizes = [4, 32], strides = [1, 1]} : vector<4x128xf32> to vector<4x32xf32>
    %212 = vector.extract_strided_slice %209 {offsets = [0, 64], sizes = [4, 32], strides = [1, 1]} : vector<4x128xf32> to vector<4x32xf32>
    %213 = vector.extract_strided_slice %209 {offsets = [0, 96], sizes = [4, 32], strides = [1, 1]} : vector<4x128xf32> to vector<4x32xf32>
    %214 = arith.mulf %211, %198 : vector<4x32xf32>
    %215 = arith.mulf %210, %212 : vector<4x32xf32>
    %216 = arith.addf %214, %215 : vector<4x32xf32>
    %217 = math.tanh %216 : vector<4x32xf32>
    %218 = arith.mulf %213, %217 : vector<4x32xf32>
    %c4_i32 = arith.constant 4 : i32
    %219 = vector.broadcast %c4_i32 : i32 to vector<4x1xi32>
    %220 = arith.cmpi sgt, %26, %219 : vector<4x1xi32>
    %cst_49 = arith.constant 0.000000e+00 : f32
    %221 = vector.shape_cast %220 : vector<4x1xi1> to vector<4x1xi1>
    %222 = vector.broadcast %221 : vector<4x1xi1> to vector<4x32xi1>
    %223 = vector.broadcast %cst_49 : f32 to vector<4x32xf32>
    %224 = arith.select %222, %218, %223 : vector<4x32xi1>, vector<4x32xf32>
    %cst_50 = arith.constant dense<0.000000e+00> : vector<4x128xf32>
    %225 = tpu.matmul %224, %3, %cst_50 {dimension_numbers = #tpu.dot_dimension_numbers<[1], [0], [0], [1], [0, 0, 1, 1], [], []>} : vector<4x32xf32>, vector<32x128xf32>, vector<4x128xf32> -> vector<4x128xf32>
    %226 = vector.broadcast %4 : vector<1x128xf32> to vector<4x128xf32>
    %227 = arith.addf %225, %226 : vector<4x128xf32>
    %c0_51 = arith.constant 0 : index
    %c4 = arith.constant 4 : index
    %c0_52 = arith.constant 0 : index
    %228 = vector.load %arg7[%c0_51, %c4, %c0_52] : memref<4x8x128xf32, #tpu.memory_space<vmem>>, vector<4x1x128xf32>
    %229 = vector.shape_cast %228 : vector<4x1x128xf32> to vector<4x128xf32>
    %230 = vector.shape_cast %227 : vector<4x128xf32> to vector<4x1x128xf32>
    tpu.vector_store %arg7[%c0_51, %c4, %c0_52], %230 {strides = array<i32>} : memref<4x8x128xf32, #tpu.memory_space<vmem>>, vector<4x1x128xf32>,
    %231 = vector.shape_cast %220 : vector<4x1xi1> to vector<4x1xi1>
    %232 = vector.broadcast %231 : vector<4x1xi1> to vector<4x32xi1>
    %233 = arith.select %232, %218, %195 : vector<4x32xi1>, vector<4x32xf32>
    %234 = vector.shape_cast %220 : vector<4x1xi1> to vector<4x1xi1>
    %235 = vector.broadcast %234 : vector<4x1xi1> to vector<4x32xi1>
    %236 = arith.select %235, %216, %198 : vector<4x32xi1>, vector<4x32xf32>
    %237 = vector.extract_strided_slice %32 {offsets = [0, 5, 0], sizes = [4, 1, 128], strides = [1, 1, 1]} : vector<4x8x128xf32> to vector<4x1x128xf32>
    %238 = vector.shape_cast %237 : vector<4x1x128xf32> to vector<4x128xf32>
    %cst_53 = arith.constant dense<0.000000e+00> : vector<4x128xf32>
    %239 = tpu.matmul %233, %1, %cst_53 {dimension_numbers = #tpu.dot_dimension_numbers<[1], [0], [0], [1], [0, 0, 1, 1], [], []>} : vector<4x32xf32>, vector<32x128xf32>, vector<4x128xf32> -> vector<4x128xf32>
    %240 = arith.addf %238, %239 : vector<4x128xf32>
    %241 = vector.broadcast %41 : vector<1x128xf32> to vector<4x128xf32>
    %242 = arith.mulf %240, %241 : vector<4x128xf32>
    %243 = math.tanh %242 : vector<4x128xf32>
    %244 = vector.broadcast %41 : vector<1x128xf32> to vector<4x128xf32>
    %245 = arith.mulf %243, %244 : vector<4x128xf32>
    %246 = vector.broadcast %44 : vector<1x128xf32> to vector<4x128xf32>
    %247 = arith.addf %245, %246 : vector<4x128xf32>
    %248 = vector.extract_strided_slice %247 {offsets = [0, 0], sizes = [4, 32], strides = [1, 1]} : vector<4x128xf32> to vector<4x32xf32>
    %249 = vector.extract_strided_slice %247 {offsets = [0, 32], sizes = [4, 32], strides = [1, 1]} : vector<4x128xf32> to vector<4x32xf32>
    %250 = vector.extract_strided_slice %247 {offsets = [0, 64], sizes = [4, 32], strides = [1, 1]} : vector<4x128xf32> to vector<4x32xf32>
    %251 = vector.extract_strided_slice %247 {offsets = [0, 96], sizes = [4, 32], strides = [1, 1]} : vector<4x128xf32> to vector<4x32xf32>
    %252 = arith.mulf %249, %236 : vector<4x32xf32>
    %253 = arith.mulf %248, %250 : vector<4x32xf32>
    %254 = arith.addf %252, %253 : vector<4x32xf32>
    %255 = math.tanh %254 : vector<4x32xf32>
    %256 = arith.mulf %251, %255 : vector<4x32xf32>
    %c5_i32 = arith.constant 5 : i32
    %257 = vector.broadcast %c5_i32 : i32 to vector<4x1xi32>
    %258 = arith.cmpi sgt, %26, %257 : vector<4x1xi32>
    %cst_54 = arith.constant 0.000000e+00 : f32
    %259 = vector.shape_cast %258 : vector<4x1xi1> to vector<4x1xi1>
    %260 = vector.broadcast %259 : vector<4x1xi1> to vector<4x32xi1>
    %261 = vector.broadcast %cst_54 : f32 to vector<4x32xf32>
    %262 = arith.select %260, %256, %261 : vector<4x32xi1>, vector<4x32xf32>
    %cst_55 = arith.constant dense<0.000000e+00> : vector<4x128xf32>
    %263 = tpu.matmul %262, %3, %cst_55 {dimension_numbers = #tpu.dot_dimension_numbers<[1], [0], [0], [1], [0, 0, 1, 1], [], []>} : vector<4x32xf32>, vector<32x128xf32>, vector<4x128xf32> -> vector<4x128xf32>
    %264 = vector.broadcast %4 : vector<1x128xf32> to vector<4x128xf32>
    %265 = arith.addf %263, %264 : vector<4x128xf32>
    %c0_56 = arith.constant 0 : index
    %c5 = arith.constant 5 : index
    %c0_57 = arith.constant 0 : index
    %266 = vector.load %arg7[%c0_56, %c5, %c0_57] : memref<4x8x128xf32, #tpu.memory_space<vmem>>, vector<4x1x128xf32>
    %267 = vector.shape_cast %266 : vector<4x1x128xf32> to vector<4x128xf32>
    %268 = vector.shape_cast %265 : vector<4x128xf32> to vector<4x1x128xf32>
    tpu.vector_store %arg7[%c0_56, %c5, %c0_57], %268 {strides = array<i32>} : memref<4x8x128xf32, #tpu.memory_space<vmem>>, vector<4x1x128xf32>,
    %269 = vector.shape_cast %258 : vector<4x1xi1> to vector<4x1xi1>
    %270 = vector.broadcast %269 : vector<4x1xi1> to vector<4x32xi1>
    %271 = arith.select %270, %256, %233 : vector<4x32xi1>, vector<4x32xf32>
    %272 = vector.shape_cast %258 : vector<4x1xi1> to vector<4x1xi1>
    %273 = vector.broadcast %272 : vector<4x1xi1> to vector<4x32xi1>
    %274 = arith.select %273, %254, %236 : vector<4x32xi1>, vector<4x32xf32>
    %275 = vector.extract_strided_slice %32 {offsets = [0, 6, 0], sizes = [4, 1, 128], strides = [1, 1, 1]} : vector<4x8x128xf32> to vector<4x1x128xf32>
    %276 = vector.shape_cast %275 : vector<4x1x128xf32> to vector<4x128xf32>
    %cst_58 = arith.constant dense<0.000000e+00> : vector<4x128xf32>
    %277 = tpu.matmul %271, %1, %cst_58 {dimension_numbers = #tpu.dot_dimension_numbers<[1], [0], [0], [1], [0, 0, 1, 1], [], []>} : vector<4x32xf32>, vector<32x128xf32>, vector<4x128xf32> -> vector<4x128xf32>
    %278 = arith.addf %276, %277 : vector<4x128xf32>
    %279 = vector.broadcast %41 : vector<1x128xf32> to vector<4x128xf32>
    %280 = arith.mulf %278, %279 : vector<4x128xf32>
    %281 = math.tanh %280 : vector<4x128xf32>
    %282 = vector.broadcast %41 : vector<1x128xf32> to vector<4x128xf32>
    %283 = arith.mulf %281, %282 : vector<4x128xf32>
    %284 = vector.broadcast %44 : vector<1x128xf32> to vector<4x128xf32>
    %285 = arith.addf %283, %284 : vector<4x128xf32>
    %286 = vector.extract_strided_slice %285 {offsets = [0, 0], sizes = [4, 32], strides = [1, 1]} : vector<4x128xf32> to vector<4x32xf32>
    %287 = vector.extract_strided_slice %285 {offsets = [0, 32], sizes = [4, 32], strides = [1, 1]} : vector<4x128xf32> to vector<4x32xf32>
    %288 = vector.extract_strided_slice %285 {offsets = [0, 64], sizes = [4, 32], strides = [1, 1]} : vector<4x128xf32> to vector<4x32xf32>
    %289 = vector.extract_strided_slice %285 {offsets = [0, 96], sizes = [4, 32], strides = [1, 1]} : vector<4x128xf32> to vector<4x32xf32>
    %290 = arith.mulf %287, %274 : vector<4x32xf32>
    %291 = arith.mulf %286, %288 : vector<4x32xf32>
    %292 = arith.addf %290, %291 : vector<4x32xf32>
    %293 = math.tanh %292 : vector<4x32xf32>
    %294 = arith.mulf %289, %293 : vector<4x32xf32>
    %c6_i32 = arith.constant 6 : i32
    %295 = vector.broadcast %c6_i32 : i32 to vector<4x1xi32>
    %296 = arith.cmpi sgt, %26, %295 : vector<4x1xi32>
    %cst_59 = arith.constant 0.000000e+00 : f32
    %297 = vector.shape_cast %296 : vector<4x1xi1> to vector<4x1xi1>
    %298 = vector.broadcast %297 : vector<4x1xi1> to vector<4x32xi1>
    %299 = vector.broadcast %cst_59 : f32 to vector<4x32xf32>
    %300 = arith.select %298, %294, %299 : vector<4x32xi1>, vector<4x32xf32>
    %cst_60 = arith.constant dense<0.000000e+00> : vector<4x128xf32>
    %301 = tpu.matmul %300, %3, %cst_60 {dimension_numbers = #tpu.dot_dimension_numbers<[1], [0], [0], [1], [0, 0, 1, 1], [], []>} : vector<4x32xf32>, vector<32x128xf32>, vector<4x128xf32> -> vector<4x128xf32>
    %302 = vector.broadcast %4 : vector<1x128xf32> to vector<4x128xf32>
    %303 = arith.addf %301, %302 : vector<4x128xf32>
    %c0_61 = arith.constant 0 : index
    %c6 = arith.constant 6 : index
    %c0_62 = arith.constant 0 : index
    %304 = vector.load %arg7[%c0_61, %c6, %c0_62] : memref<4x8x128xf32, #tpu.memory_space<vmem>>, vector<4x1x128xf32>
    %305 = vector.shape_cast %304 : vector<4x1x128xf32> to vector<4x128xf32>
    %306 = vector.shape_cast %303 : vector<4x128xf32> to vector<4x1x128xf32>
    tpu.vector_store %arg7[%c0_61, %c6, %c0_62], %306 {strides = array<i32>} : memref<4x8x128xf32, #tpu.memory_space<vmem>>, vector<4x1x128xf32>,
    %307 = vector.shape_cast %296 : vector<4x1xi1> to vector<4x1xi1>
    %308 = vector.broadcast %307 : vector<4x1xi1> to vector<4x32xi1>
    %309 = arith.select %308, %294, %271 : vector<4x32xi1>, vector<4x32xf32>
    %310 = vector.shape_cast %296 : vector<4x1xi1> to vector<4x1xi1>
    %311 = vector.broadcast %310 : vector<4x1xi1> to vector<4x32xi1>
    %312 = arith.select %311, %292, %274 : vector<4x32xi1>, vector<4x32xf32>
    %313 = vector.extract_strided_slice %32 {offsets = [0, 7, 0], sizes = [4, 1, 128], strides = [1, 1, 1]} : vector<4x8x128xf32> to vector<4x1x128xf32>
    %314 = vector.shape_cast %313 : vector<4x1x128xf32> to vector<4x128xf32>
    %cst_63 = arith.constant dense<0.000000e+00> : vector<4x128xf32>
    %315 = tpu.matmul %309, %1, %cst_63 {dimension_numbers = #tpu.dot_dimension_numbers<[1], [0], [0], [1], [0, 0, 1, 1], [], []>} : vector<4x32xf32>, vector<32x128xf32>, vector<4x128xf32> -> vector<4x128xf32>
    %316 = arith.addf %314, %315 : vector<4x128xf32>
    %317 = vector.broadcast %41 : vector<1x128xf32> to vector<4x128xf32>
    %318 = arith.mulf %316, %317 : vector<4x128xf32>
    %319 = math.tanh %318 : vector<4x128xf32>
    %320 = vector.broadcast %41 : vector<1x128xf32> to vector<4x128xf32>
    %321 = arith.mulf %319, %320 : vector<4x128xf32>
    %322 = vector.broadcast %44 : vector<1x128xf32> to vector<4x128xf32>
    %323 = arith.addf %321, %322 : vector<4x128xf32>
    %324 = vector.extract_strided_slice %323 {offsets = [0, 0], sizes = [4, 32], strides = [1, 1]} : vector<4x128xf32> to vector<4x32xf32>
    %325 = vector.extract_strided_slice %323 {offsets = [0, 32], sizes = [4, 32], strides = [1, 1]} : vector<4x128xf32> to vector<4x32xf32>
    %326 = vector.extract_strided_slice %323 {offsets = [0, 64], sizes = [4, 32], strides = [1, 1]} : vector<4x128xf32> to vector<4x32xf32>
    %327 = vector.extract_strided_slice %323 {offsets = [0, 96], sizes = [4, 32], strides = [1, 1]} : vector<4x128xf32> to vector<4x32xf32>
    %328 = arith.mulf %325, %312 : vector<4x32xf32>
    %329 = arith.mulf %324, %326 : vector<4x32xf32>
    %330 = arith.addf %328, %329 : vector<4x32xf32>
    %331 = math.tanh %330 : vector<4x32xf32>
    %332 = arith.mulf %327, %331 : vector<4x32xf32>
    %c7_i32 = arith.constant 7 : i32
    %333 = vector.broadcast %c7_i32 : i32 to vector<4x1xi32>
    %334 = arith.cmpi sgt, %26, %333 : vector<4x1xi32>
    %cst_64 = arith.constant 0.000000e+00 : f32
    %335 = vector.shape_cast %334 : vector<4x1xi1> to vector<4x1xi1>
    %336 = vector.broadcast %335 : vector<4x1xi1> to vector<4x32xi1>
    %337 = vector.broadcast %cst_64 : f32 to vector<4x32xf32>
    %338 = arith.select %336, %332, %337 : vector<4x32xi1>, vector<4x32xf32>
    %cst_65 = arith.constant dense<0.000000e+00> : vector<4x128xf32>
    %339 = tpu.matmul %338, %3, %cst_65 {dimension_numbers = #tpu.dot_dimension_numbers<[1], [0], [0], [1], [0, 0, 1, 1], [], []>} : vector<4x32xf32>, vector<32x128xf32>, vector<4x128xf32> -> vector<4x128xf32>
    %340 = vector.broadcast %4 : vector<1x128xf32> to vector<4x128xf32>
    %341 = arith.addf %339, %340 : vector<4x128xf32>
    %c0_66 = arith.constant 0 : index
    %c7 = arith.constant 7 : index
    %c0_67 = arith.constant 0 : index
    %342 = vector.load %arg7[%c0_66, %c7, %c0_67] : memref<4x8x128xf32, #tpu.memory_space<vmem>>, vector<4x1x128xf32>
    %343 = vector.shape_cast %342 : vector<4x1x128xf32> to vector<4x128xf32>
    %344 = vector.shape_cast %341 : vector<4x128xf32> to vector<4x1x128xf32>
    tpu.vector_store %arg7[%c0_66, %c7, %c0_67], %344 {strides = array<i32>} : memref<4x8x128xf32, #tpu.memory_space<vmem>>, vector<4x1x128xf32>,
    return
  }
}

</mosaic_0001>

<bundles_post_ra>
// kernel: simple_rnn_forward.1
= control target key start
LH: loop header
LB: loop body
LE: loop exit
PB: predicated region body
PF: predicated region fallthrough
CT: control target
= control target key end

     0   :  { %12 = vsyncpa [#allocation4], 0  ;;  %s4345_s0 = inlined_call_operand.vmem [shape: f32[4,8,4], index: 0, kind: input, shape index: {}]   ;;  %s4346_s1 = inlined_call_operand.vmem [shape: s32[4], index: 1, kind: input, shape index: {}]   ;;  %s4347_s2 = inlined_call_operand.vmem [shape: f32[4,128], index: 2, kind: input, shape index: {}]   ;;  %s4348_s3 = inlined_call_operand.vmem [shape: f32[32,128], index: 3, kind: input, shape index: {}]   ;;  %s4349_s4 = inlined_call_operand.vmem [shape: f32[1,128], index: 4, kind: input, shape index: {}]   ;;  %s4350_s5 = inlined_call_operand.hbm [shape: f32[32,128], index: 5, kind: input, shape index: {}]   ;;  %s4351_s6 = inlined_call_operand.vmem [shape: f32[1,128], index: 6, kind: input, shape index: {}]   ;;  %s4352_s7 = inlined_call_operand.vmem [shape: f32[4,8,128], index: 7, kind: output, shape index: {}]  }
   0x1   :  { %s22_s26 = sshll.u32 %s4346_s1, 4  ;;  %s23_s26 = int_to_ptr.vmem [resolvable:$true] %s22_s26 }
   0x2   :  { %13 = vsyncpa [#allocation3], 0  ;;  %s3239_s27 = scalar_lea.vmem %s23_s26, 16  ;;  %p3244_p1 = scmp.lt.s32.totalorder %s23_s26, %s23_s26 }
   0x3   :  { %p3240_p0 = scmp.ne.s32.totalorder %s23_s26, %s3239_s27  ;;  %p3245_p2 = scmp.lt.s32.totalorder %s3239_s27, %s3239_s27 }
   0x5   :  { %p3246_p3 = por %p3245_p2, %p3244_p1 }
   0x7   :  { %p3247_p4 = pnand %p3246_p3, %p3240_p0 }
   0x9   :  { %3250 = shalt.err (!%p3247_p4)
}
   0xa   :  { %s3275_s28 = smov [#allocation2]   ;;  %s3276_s29 = smov [#allocation5]  }
   0xb   :  { %25 = dma.vmem_to_smem %s23_s26, 16, %s3275_s28, [#allocation4]  }
   0xc   :  { %s37_s30 = sshll.u32 %s3276_s29, 4  ;;  %s38_s30 = int_to_ptr.vmem [resolvable:$true] %s37_s30 }
   0xd   :  { %s3259_s8 = scalar_lea.vmem %s38_s30, 512  ;;  %p3264_p6 = scmp.lt.s32.totalorder %s38_s30, %s38_s30 }
   0xe   :  { %p3260_p5 = scmp.ne.s32.totalorder %s38_s30, %s3259_s8  ;;  %p3265_p7 = scmp.lt.s32.totalorder %s3259_s8, %s3259_s8 }
  0x10   :  { %p3266_p8 = por %p3265_p7, %p3264_p6 }
  0x12   :  { %p3267_p9 = pnand %p3266_p8, %p3260_p5 }
  0x14   :  { %3270 = shalt.err (!%p3267_p9)
}
  0x15   :  { %s3277_s1 = smov 128   ;;  %s3278_s9 = smov 8  }
  0x16   :  { %43 = dma.hbm_to_vmem [thread:$0]  %s4350_s5, 512, %s38_s30, [#allocation3], %s3277_s1, %s3277_s1, %s3278_s9  }
  0x17   :  { %3271 = dma.done.wait [#allocation4], 16  }
  0x18   :  { %3272 = vsyncadd [#allocation4], 4294967280 }
  0x19   :  { %3273 = dma.done.wait [#allocation3], 512  }
  0x1a   :  { %3274 = vsyncadd [#allocation3], 4294966784 }
  0x1b   :  { %52 = sfence }
  0x1c   :  { %v53_v0 = vld [vmem:[%s4347_s2] sm:$0xf]  ;;  %vm105_vm0 = vcmask 1043456   ;;  %vm92_vm1 = vcmask 31744   ;;  %v3279_v2 = vmov 0.0   ;;  %v3342_v3 = vld [vmem:[%s4348_s3 + $0x18] sm:$0xff]  ;;  %v64_v10 = vlaneseq }
  0x1d   :  { %v82_v1 = vld [vmem:[%s4345_s0] sm:$0xff]  ;;  %2907 = vmatprep.subr.msk.mxu0 %vm105_vm0, %v53_v0  ;;  %2915 = vmatprep.subr.mxu1 %v3279_v2  ;;  %v83_v4 = vld [vmem:[%s4345_s0 + $0x8] sm:$0xff]  ;;  %v3351_v5 = vld [vmem:[%s4348_s3 + $0x10] sm:$0xff]  ;;  %vm3280_vm2 = vmmov 0   ;;  %v3281_v22 = vmov 0.5   ;;  %s3283_s29 = smov 32  }
  0x1e   :  { %2908 = vmatpush3.msk.msra.mxu0 %vm105_vm0, %v53_v0  ;;  %2909 = vmatprep.mubr.msk.f32.mxu0 %vm92_vm1, %v82_v1  ;;  %v84_v6 = vld [vmem:[%s4345_s0 + $0x10] sm:$0xff]  ;;  %v3363_v7 = vld [vmem:[%s4348_s3 + $0x8] sm:$0xff]  ;;  %v85_v8 = vld [vmem:[%s4345_s0 + $0x18] sm:$0xff]  ;;  %v195_v11 = vand.u32 127, %v64_v10  ;;  %vm379_vm6 = vcmask 1041409   ;;  %vm382_vm7 = vcmask 1042434  }
  0x1f   :  { %2916 = vmatpush3.msra.mxu1 %v3342_v3  ;;  %2910 = vmatmul.mubr.msk.f32.vlgmr.msra.gmra.mxu0 %vm92_vm1, %v83_v4  ;;  %v3375_v9 = vld [vmem:[%s4348_s3] sm:$0xff]  ;;  %v3471_v17 = vld [vmem:[#allocation5 + $0x8] sm:$0xff]  ;;  %vm385_vm8 = vcmask 1043459   ;;  %s3284_s30 = smov 96   ;;  %s67_s8 = sld [smem:[#allocation2]]  ;;  %vm201_vm13 = vcmask 261120  }
  0x20   :  { %2917 = vmatprep.subr.mxu1 %v3279_v2  ;;  %2912 = vmatprep.mubr.msk.f32.mxu0 %vm92_vm1, %v84_v6  ;;  %v2784_v13 = vld [vmem:[%s4349_s4] ss:$0 sm:$0xff]  ;;  %vm196_vm3 = vcmp.ge.s32.totalorder %v195_v11, 64  ;;  %vm197_vm4 = vcmp.lt.s32.totalorder %v195_v11, 96  ;;  %s3282_s4 = smov 64   ;;  %s2781_s1 = sld [smem:[#allocation2 + $0x1]] }
  0x21   :  { %2918 = vmatpush3.msra.mxu1 %v3351_v5  ;;  %2923 = vmatprep.mubr.msk.f32.mxu1 %vm3280_vm2, %v3279_v2  ;;  %vm3402_vm5 = vmand %vm196_vm3, %vm197_vm4  ;;  %s2782_s9 = sld [smem:[#allocation2 + $0x2]] }
  0x22   :  { %2919 = vmatprep.subr.mxu1 %v3279_v2  ;;  %2926 = vmatprep.subr.mxu0 %v3279_v2  ;;  %v3414_v23 = vsel %vm3402_vm5, 1.0, %v3281_v22  ;;  %v3426_v38 = vsel %vm3402_vm5, 0.0, %v3281_v22  ;;  %s2783_s10 = sld [smem:[#allocation2 + $0x3]] }
  0x23   :  { %2920 = vmatpush3.msra.mxu1 %v3363_v7  ;;  %2913 = vmatmul.mubr.msk.f32.gmra.mxu0 %vm92_vm1, %v85_v8 }
  0x24   :  { %2921 = vmatprep.subr.mxu1 %v3279_v2  ;;  %2934 = vmatprep.mubr.msk.f32.mxu0 %vm3280_vm2, %v3279_v2 }
  0x25   :  { %2922 = vmatpush3.msra.mxu1 %v3375_v9 }
  0x26   :  { %2924 = vmatmul.mubr.f32.vlgmr.msra.gmra.mxu1 %v3279_v2  ;;  %2937 = vmatprep.subr.mxu1 %v3279_v2 }
  0x27   :  { %2938 = vmatpush3.msra.mxu1 %v3342_v3  ;;  %2945 = vmatprep.mubr.msk.f32.mxu1 %vm3280_vm2, %v3279_v2 }
  0x28   :  { %2939 = vmatprep.subr.mxu1 %v3279_v2 }
  0x29   :  { %2940 = vmatpush3.msra.mxu1 %v3351_v5 }
  0x2a   :  { %2941 = vmatprep.subr.mxu1 %v3279_v2 }
  0x2b   :  { %2942 = vmatpush3.msra.mxu1 %v3363_v7 }
  0x2c   :  { %2943 = vmatprep.subr.mxu1 %v3279_v2 }
  0x2d   :  { %2944 = vmatpush3.msra.mxu1 %v3375_v9 }
  0x2e   :  { %2959 = vmatprep.subr.mxu1 %v3279_v2 }
  0xdf   :  { %v2911_v12 = vpop.f32.mrf.mxu0 }
  0xe0   :  { %v3408_v20 = vadd.f32 %v2911_v12, %v2784_v13 }
  0xe1   :  { %v175_v14 = vpop.f32.mrf.mxu0 }
  0xe2   :  { %v3400_v15 = vadd.f32 %v2784_v13, %v175_v14  ;;  %v3467_v14 = vld [vmem:[#allocation5 + $0x10] sm:$0xff] }
  0xe3   :  { %v2914_v16 = vpop.f32.mrf.mxu0 }
  0xe4   :  { %v3406_v18 = vadd.f32 %v2914_v16, %v2784_v13 }
  0xe5   :  { %v185_v19 = vpop.f32.mrf.mxu0 }
  0xe6   :  { %v3410_v21 = vadd.f32 %v2784_v13, %v185_v19  ;;  %v271_v24 = vpop.f32.mrf.mxu1  ;;  %v3465_v13 = vld [vmem:[#allocation5 + $0x18] sm:$0xff] }
  0xe7   :  { %v276_v25 = vrot.slane %v271_v24, 1  ;;  %v277_v26 = vrot.slane %v271_v24, 2  ;;  %v278_v27 = vrot.slane %v271_v24, 3  ;;  %v283_v28 = vadd.f32 %v271_v24, %v3400_v15  ;;  %2927 = vmatpush3.msra.mxu0 %v3465_v13 }
  0xe8   :  { %v2925_v29 = vpop.f32.mrf.mxu1  ;;  %2928 = vmatprep.subr.mxu0 %v3279_v2 }
  0xe9   :  { %v284_v30 = vadd.f32 %v276_v25, %v3408_v20  ;;  %v285_v31 = vadd.f32 %v277_v26, %v3410_v21  ;;  %v286_v32 = vadd.f32 %v278_v27, %v3406_v18  ;;  %v287_v33 = vmul.f32 %v283_v28, %v3414_v23  ;;  %2929 = vmatpush3.msra.mxu0 %v3467_v14 }
  0xea   :  { %2930 = vmatprep.subr.mxu0 %v3279_v2 }
  0xeb   :  { %v288_v34 = vmul.f32 %v284_v30, %v3414_v23  ;;  %v289_v35 = vmul.f32 %v285_v31, %v3414_v23  ;;  %v290_v36 = vmul.f32 %v286_v32, %v3414_v23  ;;  %3102 = vtanh.f32 %v287_v33  ;;  %2931 = vmatpush3.msra.mxu0 %v3471_v17  ;;  %v3484_v31 = vld [vmem:[#allocation5] sm:$0xff] }
  0xec   :  { %2932 = vmatprep.subr.mxu0 %v3279_v2 }
  0xed   :  { %3104 = vtanh.f32 %v288_v34  ;;  %2933 = vmatpush3.msra.mxu0 %v3484_v31 }
  0xee   :  { %3106 = vtanh.f32 %v289_v35  ;;  %2948 = vmatprep.subr.mxu0 %v3279_v2 }
  0xef   :  { %3108 = vtanh.f32 %v290_v36 }
  0xf8   :  { %v3103_v37 = vpop.eup %3102 }
  0xf9   :  { %v295_v39 = vmul.f32 %v3103_v37, %v3414_v23 }
  0xfa   :  { %v3105_v40 = vpop.eup %3104 }
  0xfb   :  { %v3107_v41 = vpop.eup %3106  ;;  %v3430_v42 = vadd.f32 %v295_v39, %v3426_v38  ;;  %v296_v43 = vmul.f32 %v3105_v40, %v3414_v23 }
  0xfc   :  { %v3109_v44 = vpop.eup %3108  ;;  %v297_v47 = vmul.f32 %v3107_v41, %v3414_v23 }
  0xfd   :  { %311 = vrot.lane.b32.xlu1 %v3430_v42, %s3282_s4  ;;  %v3436_v45 = vadd.f32 %v296_v43, %v3426_v38  ;;  %v298_v46 = vmul.f32 %v3109_v44, %v3414_v23  ;;  %v303_v61 = vmul.f32 0.0, %v3430_v42 }
  0xfe   :  { %v3448_v49 = vadd.f32 %v297_v47, %v3426_v38  ;;  %v65_v47 = vshrl.u32 %v64_v10, 7 }
  0xff   :  { %313 = vrot.lane.b32.xlu0 %v3436_v45, %s3282_s4  ;;  %v3443_v48 = vadd.f32 %v298_v46, %v3426_v38  ;;  %v304_v58 = vmul.f32 0.0, %v3436_v45 }
 0x100   :  { %v305_v62 = vmul.f32 0.0, %v3448_v49  ;;  %vm66_vm9 = vcmp.eq.s32.totalorder %v65_v47, 0  ;;  %vm70_vm10 = vcmp.eq.s32.totalorder %v65_v47, 1  ;;  %vm74_vm11 = vcmp.eq.s32.totalorder %v65_v47, 2 }
 0x101   :  { %317 = vrot.lane.b32.xlu1 %v3443_v48, %s3282_s4  ;;  %v306_v6 = vmul.f32 0.0, %v3443_v48  ;;  %vm78_vm12 = vcmp.eq.s32.totalorder %v65_v47, 3 }
 0x103   :  { %315 = vrot.lane.b32.xlu0 %v3448_v49, %s3282_s4 }
 0x16f   :  { %v312_v50 = vpop.permute.xlu1 %311 }
 0x170   :  { %v323_v54 = vmul.f32 %v312_v50, %v3430_v42 }
 0x171   :  { %v314_v51 = vpop.permute.xlu0 %313 }
 0x172   :  { %v324_v52 = vmul.f32 %v314_v51, %v3436_v45  ;;  %v76_v51 = vstv %s2782_s9 }
 0x173   :  { %v318_v56 = vpop.permute.xlu1 %317 }
 0x174   :  { %333 = vrot.lane.b32.xlu0 %v324_v52, %s3283_s29  ;;  %v326_v57 = vmul.f32 %v318_v56, %v3443_v48  ;;  %v3285_v56 = vmov 1966171168  }
 0x175   :  { %v316_v53 = vpop.permute.xlu0 %315 }
 0x176   :  { %v325_v55 = vmul.f32 %v316_v53, %v3448_v49  ;;  %v80_v53 = vstv %s2783_s10 }
 0x178   :  { %335 = vrot.lane.b32.xlu1 %v325_v55, %s3283_s29  ;;  %331 = vrot.lane.b32.xlu0 %v323_v54, %s3283_s29 }
 0x17c   :  { %337 = vrot.lane.b32.xlu1 %v326_v57, %s3283_s29  ;;  %v472_v57 = vunpack.c.l.s4 %v3285_v56 }
 0x1e6   :  { %v334_v59 = vpop.permute.xlu0 %333 }
 0x1e7   :  { %v344_v60 = vadd.f32 %v334_v59, %v304_v58  ;;  %v473_v58 = vunpack.c.0.s8 %v472_v57  ;;  %v3531_v59 = vld [vmem:[%s4351_s6] ss:$0 sm:$0xff] }
 0x1e9   :  { %3110 = vtanh.f32 %v344_v60  ;;  %v507_v22 = vrot.slane %v344_v60, 7  ;;  %v3533_v60 = vsub.s32 %v473_v58, %v65_v47 }
 0x1ea   :  { %v332_v63 = vpop.permute.xlu0 %331  ;;  %v336_v0 = vpop.permute.xlu1 %335 }
 0x1eb   :  { %v343_v1 = vadd.f32 %v332_v63, %v303_v61  ;;  %v345_v4 = vadd.f32 %v336_v0, %v305_v62 }
 0x1ed   :  { %3112 = vtanh.f32 %v343_v1  ;;  %v509_v25 = vrot.slane %v345_v4, 6  ;;  %v508_v27 = vsel %vm379_vm6, %v507_v22, %v343_v1 }
 0x1ee   :  { %3114 = vtanh.f32 %v345_v4  ;;  %v338_v8 = vpop.permute.xlu1 %337 }
 0x1ef   :  { %v346_v11 = vadd.f32 %v338_v8, %v306_v6  ;;  %v510_v28 = vsel %vm382_vm7, %v509_v25, %v508_v27 }
 0x1f1   :  { %3116 = vtanh.f32 %v346_v11  ;;  %v511_v26 = vrot.slane %v346_v11, 5 }
 0x1f3   :  { %v512_v29 = vsel %vm385_vm8, %v511_v26, %v510_v28 }
 0x1f6   :  { %v3111_v12 = vpop.eup %3110 }
 0x1f7   :  { %357 = vrot.lane.b32.xlu0 %v3111_v12, %s3282_s4 }
 0x1fa   :  { %v3113_v16 = vpop.eup %3112 }
 0x1fb   :  { %v3115_v19 = vpop.eup %3114  ;;  %355 = vrot.lane.b32.xlu0 %v3113_v16, %s3282_s4 }
 0x1fc   :  { %359 = vrot.lane.b32.xlu1 %v3115_v19, %s3282_s4 }
 0x1fe   :  { %v3117_v24 = vpop.eup %3116 }
 0x200   :  { %361 = vrot.lane.b32.xlu1 %v3117_v24, %s3282_s4 }
 0x204   :  { %513 = vrot.lane.b32.xlu1 %v512_v29, %s3284_s30 }
 0x269   :  { %v358_v30 = vpop.permute.xlu0 %357 }
 0x26a   :  { %v368_v32 = vmul.f32 %v358_v30, %v3436_v45 }
 0x26c   :  { %v378_v37 = vrot.slane %v368_v32, 7 }
 0x26d   :  { %v356_v33 = vpop.permute.xlu0 %355 }
 0x26e   :  { %v360_v34 = vpop.permute.xlu1 %359  ;;  %v367_v36 = vmul.f32 %v356_v33, %v3430_v42  ;;  %v68_v42 = vstv %s67_s8 }
 0x26f   :  { %v369_v35 = vmul.f32 %v360_v34, %v3448_v49  ;;  %v69_v49 = vsel %vm66_vm9, %v68_v42, 0 }
 0x270   :  { %v380_v43 = vsel %vm379_vm6, %v378_v37, %v367_v36 }
 0x271   :  { %v381_v39 = vrot.slane %v369_v35, 6 }
 0x272   :  { %v362_v40 = vpop.permute.xlu1 %361 }
 0x273   :  { %v370_v41 = vmul.f32 %v362_v40, %v3443_v48  ;;  %v383_v46 = vsel %vm382_vm7, %v381_v39, %v380_v43  ;;  %v72_v48 = vstv %s2781_s1 }
 0x274   :  { %v73_v50 = vsel %vm70_vm10, %v72_v48, %v69_v49 }
 0x275   :  { %v384_v44 = vrot.slane %v370_v41, 5  ;;  %v77_v52 = vsel %vm74_vm11, %v76_v51, %v73_v50 }
 0x276   :  { %v3497_v54 = vsel %vm78_vm12, %v80_v53, %v77_v52 }
 0x277   :  { %v386_v45 = vsel %vm385_vm8, %v384_v44, %v383_v46  ;;  %vm371_vm14 = vcmp.gt.s32.totalorder %v3497_v54, 0  ;;  %vm699_vm15 = vcmp.gt.s32.totalorder %v3497_v54, 1  ;;  %vm1022_vm0 = vcmp.gt.s32.totalorder %v3497_v54, 2 }
 0x278   :  { %387 = vrot.lane.b32.xlu0 %v386_v45, %s3283_s29  ;;  %v514_v45 = vpop.permute.xlu1 %513  ;;  %vm1345_vm1 = vcmp.gt.s32.totalorder %v3497_v54, 3  ;;  %vm1670_vm3 = vcmp.gt.s32.totalorder %v3497_v54, 4  ;;  %vm1997_vm4 = vcmp.gt.s32.totalorder %v3497_v54, 5  ;;  %vm2324_vm5 = vcmp.gt.s32.totalorder %v3497_v54, 6 }
 0x279   :  { %v3578_v42 = vsel %vm371_vm14, %v514_v45, 0.0 }
 0x27a   :  { %v616_v48 = vrot.slane %v3578_v42, 7  ;;  %v617_v50 = vrot.slane %v3578_v42, 1  ;;  %v618_v51 = vrot.slane %v3578_v42, 2 }
 0x2ea   :  { %v388_v55 = vpop.permute.xlu0 %387 }
 0x2eb   :  { %v3502_v10 = vsel %vm371_vm14, %v388_v55, 0.0 }
 0x2ec   :  { %2935 = vmatmul.mubr.msk.f32.vlgmr.msra.gmra.mxu0 %vm201_vm13, %v3502_v10  ;;  %2946 = vmatmul.mubr.msk.f32.vlgmr.msra.gmra.mxu1 %vm201_vm13, %v3502_v10 }
 0x2ed   :  { %2949 = vmatpush3.msra.mxu0 %v3465_v13  ;;  %2960 = vmatpush3.msra.mxu1 %v3342_v3 }
 0x2ee   :  { %2950 = vmatprep.subr.mxu0 %v3279_v2  ;;  %2961 = vmatprep.subr.mxu1 %v3279_v2 }
 0x2ef   :  { %2951 = vmatpush3.msra.mxu0 %v3467_v14  ;;  %2962 = vmatpush3.msra.mxu1 %v3351_v5 }
 0x2f0   :  { %2952 = vmatprep.subr.mxu0 %v3279_v2  ;;  %2963 = vmatprep.subr.mxu1 %v3279_v2 }
 0x2f1   :  { %2953 = vmatpush3.msra.mxu0 %v3471_v17  ;;  %2964 = vmatpush3.msra.mxu1 %v3363_v7 }
 0x2f2   :  { %2965 = vmatprep.subr.mxu1 %v3279_v2  ;;  %2954 = vmatprep.subr.mxu0 %v3279_v2 }
 0x2f3   :  { %2955 = vmatpush3.msra.mxu0 %v3484_v31  ;;  %2956 = vmatprep.mubr.msk.f32.mxu0 %vm3280_vm2, %v3279_v2 }
 0x2f4   :  { %2966 = vmatpush3.msra.mxu1 %v3375_v9  ;;  %2967 = vmatprep.mubr.msk.f32.mxu1 %vm3280_vm2, %v3279_v2 }
 0x2f5   :  { %2970 = vmatprep.subr.mxu0 %v3279_v2  ;;  %2981 = vmatprep.subr.mxu1 %v3279_v2 }
 0x3ac   :  { %v466_v61 = vpop.f32.mrf.mxu0  ;;  %v583_v62 = vpop.f32.mrf.mxu1 }
 0x3ad   :  { %v467_v63 = vadd.f32 %v3531_v59, %v466_v61  ;;  %v588_v0 = vrot.slane %v583_v62, 7  ;;  %v589_v1 = vrot.slane %v583_v62, 1  ;;  %v590_v4 = vrot.slane %v583_v62, 2 }
 0x3ae   :  { %v596_v6 = vadd.f32 %v583_v62, %v3408_v20  ;;  %v2936_v8 = vpop.f32.mrf.mxu0  ;;  %v2947_v11 = vpop.f32.mrf.mxu1 }
 0x3af   :  { %v477_v12 = vrot.slane %v467_v63, %v3533_v60  ;;  %v595_v16 = vadd.f32 %v588_v0, %v3400_v15  ;;  %v597_v19 = vadd.f32 %v589_v1, %v3410_v21  ;;  %v598_v22 = vadd.f32 %v590_v4, %v3406_v18 }
 0x3b0   :  { %v600_v24 = vmul.f32 %v596_v6, %v3414_v23 }
 0x3b1   :  { %v478_v25 = vcombine.high %v477_v12, %v477_v12  ;;  %v485_v26 = vrot.slane %v477_v12, %v3533_v60  ;;  %2792 = vst.sshfl [vmem:[%s4352_s7] sm:$0x1 pattern:$0x73625140] %v477_v12  ;;  %v599_v27 = vmul.f32 %v595_v16, %v3414_v23  ;;  %v601_v28 = vmul.f32 %v597_v19, %v3414_v23 }
 0x3b2   :  { %v602_v29 = vmul.f32 %v598_v22, %v3414_v23  ;;  %3118 = vtanh.f32 %v600_v24 }
 0x3b3   :  { %v492_v30 = vrot.slane %v478_v25, %v3533_v60  ;;  %v493_v32 = vcombine.high %v485_v26, %v485_v26  ;;  %2793 = vst.sshfl [vmem:[%s4352_s7 + $0x8] sm:$0x1 pattern:$0x73625140] %v478_v25  ;;  %3120 = vtanh.f32 %v599_v27 }
 0x3b4   :  { %3122 = vtanh.f32 %v601_v28 }
 0x3b5   :  { %v494_v33 = vcombine.high %v492_v30, %v492_v30  ;;  %501 = vst [vmem:[%s4352_s7 + $0x10] sm:$0x1] %v493_v32  ;;  %3124 = vtanh.f32 %v602_v29 }
 0x3b7   :  { %502 = vst [vmem:[%s4352_s7 + $0x18] sm:$0x1] %v494_v33 }
 0x3bf   :  { %v3119_v34 = vpop.eup %3118 }
 0x3c0   :  { %v3121_v35 = vpop.eup %3120  ;;  %v608_v43 = vmul.f32 %v3119_v34, %v3414_v23 }
 0x3c1   :  { %v3123_v36 = vpop.eup %3122  ;;  %v607_v37 = vmul.f32 %v3121_v35, %v3414_v23 }
 0x3c2   :  { %v3125_v39 = vpop.eup %3124  ;;  %v609_v40 = vmul.f32 %v3123_v36, %v3414_v23  ;;  %v3574_v47 = vadd.f32 %v608_v43, %v3426_v38 }
 0x3c3   :  { %v3562_v41 = vadd.f32 %v607_v37, %v3426_v38  ;;  %v610_v46 = vmul.f32 %v3125_v39, %v3414_v23 }
 0x3c4   :  { %v3566_v44 = vadd.f32 %v609_v40, %v3426_v38 }
 0x3c5   :  { %639 = vrot.lane.b32.xlu0 %v3562_v41, %s3282_s4  ;;  %v3581_v49 = vadd.f32 %v610_v46, %v3426_v38 }
 0x3c6   :  { %643 = vrot.lane.b32.xlu1 %v3566_v44, %s3282_s4 }
 0x3c9   :  { %641 = vrot.lane.b32.xlu0 %v3574_v47, %s3282_s4 }
 0x3ca   :  { %645 = vrot.lane.b32.xlu1 %v3581_v49, %s3282_s4 }
 0x3cd   :  { %619 = vrot.lane.b32.xlu0 %v616_v48, %s3283_s29 }
 0x3ce   :  { %623 = vrot.lane.b32.xlu1 %v617_v50, %s3283_s29 }
 0x3d1   :  { %621 = vrot.lane.b32.xlu0 %v3578_v42, %s3283_s29 }
 0x3d2   :  { %625 = vrot.lane.b32.xlu1 %v618_v51, %s3283_s29 }
 0x437   :  { %v640_v52 = vpop.permute.xlu0 %639 }
 0x438   :  { %v644_v53 = vpop.permute.xlu1 %643  ;;  %v651_v55 = vmul.f32 %v640_v52, %v3562_v41 }
 0x439   :  { %v653_v56 = vmul.f32 %v644_v53, %v3566_v44 }
 0x43a   :  { %659 = vrot.lane.b32.xlu0 %v651_v55, %s3283_s29 }
 0x43b   :  { %663 = vrot.lane.b32.xlu1 %v653_v56, %s3283_s29  ;;  %v642_v57 = vpop.permute.xlu0 %641 }
 0x43c   :  { %v646_v58 = vpop.permute.xlu1 %645  ;;  %v652_v61 = vmul.f32 %v642_v57, %v3574_v47 }
 0x43d   :  { %v654_v62 = vmul.f32 %v646_v58, %v3581_v49 }
 0x43e   :  { %661 = vrot.lane.b32.xlu0 %v652_v61, %s3283_s29 }
 0x43f   :  { %665 = vrot.lane.b32.xlu1 %v654_v62, %s3283_s29  ;;  %v620_v63 = vpop.permute.xlu0 %619 }
 0x440   :  { %v624_v0 = vpop.permute.xlu1 %623  ;;  %v631_v6 = vmul.f32 %v620_v63, %v3562_v41 }
 0x441   :  { %v633_v8 = vmul.f32 %v624_v0, %v3566_v44 }
 0x443   :  { %v622_v1 = vpop.permute.xlu0 %621 }
 0x444   :  { %v626_v4 = vpop.permute.xlu1 %625  ;;  %v632_v22 = vmul.f32 %v622_v1, %v3574_v47 }
 0x445   :  { %v634_v24 = vmul.f32 %v626_v4, %v3581_v49 }
 0x4ac   :  { %v660_v11 = vpop.permute.xlu0 %659 }
 0x4ad   :  { %v664_v12 = vpop.permute.xlu1 %663  ;;  %v671_v16 = vadd.f32 %v660_v11, %v631_v6 }
 0x4ae   :  { %v673_v19 = vadd.f32 %v664_v12, %v633_v8 }
 0x4af   :  { %3126 = vtanh.f32 %v671_v16  ;;  %v827_v32 = vrot.slane %v671_v16, 1 }
 0x4b0   :  { %3128 = vtanh.f32 %v673_v19  ;;  %v662_v25 = vpop.permute.xlu0 %661  ;;  %v829_v35 = vrot.slane %v673_v19, 7 }
 0x4b1   :  { %v666_v26 = vpop.permute.xlu1 %665  ;;  %v672_v27 = vadd.f32 %v662_v25, %v632_v22 }
 0x4b2   :  { %v674_v28 = vadd.f32 %v666_v26, %v634_v24 }
 0x4b3   :  { %3130 = vtanh.f32 %v672_v27  ;;  %v828_v33 = vsel %vm379_vm6, %v672_v27, %v827_v32 }
 0x4b4   :  { %3132 = vtanh.f32 %v674_v28  ;;  %v831_v37 = vrot.slane %v674_v28, 6  ;;  %v830_v39 = vsel %vm382_vm7, %v829_v35, %v828_v33 }
 0x4b6   :  { %v832_v40 = vsel %vm385_vm8, %v831_v37, %v830_v39 }
 0x4bc   :  { %v3127_v29 = vpop.eup %3126 }
 0x4bd   :  { %v3129_v30 = vpop.eup %3128  ;;  %683 = vrot.lane.b32.xlu0 %v3127_v29, %s3282_s4 }
 0x4be   :  { %687 = vrot.lane.b32.xlu1 %v3129_v30, %s3282_s4 }
 0x4c0   :  { %v3131_v34 = vpop.eup %3130 }
 0x4c1   :  { %v3133_v36 = vpop.eup %3132  ;;  %685 = vrot.lane.b32.xlu0 %v3131_v34, %s3282_s4 }
 0x4c2   :  { %689 = vrot.lane.b32.xlu1 %v3133_v36, %s3282_s4 }
 0x4c6   :  { %833 = vrot.lane.b32.xlu1 %v832_v40, %s3284_s30 }
 0x52f   :  { %v684_v43 = vpop.permute.xlu0 %683 }
 0x530   :  { %v688_v46 = vpop.permute.xlu1 %687  ;;  %v695_v45 = vmul.f32 %v684_v43, %v3562_v41 }
 0x531   :  { %v697_v48 = vmul.f32 %v688_v46, %v3566_v44 }
 0x532   :  { %v706_v51 = vrot.slane %v695_v45, 1 }
 0x533   :  { %v686_v50 = vpop.permute.xlu0 %685  ;;  %v708_v55 = vrot.slane %v697_v48, 7 }
 0x534   :  { %v690_v52 = vpop.permute.xlu1 %689  ;;  %v696_v53 = vmul.f32 %v686_v50, %v3574_v47 }
 0x535   :  { %v698_v56 = vmul.f32 %v690_v52, %v3581_v49 }
 0x536   :  { %v707_v57 = vsel %vm379_vm6, %v696_v53, %v706_v51 }
 0x537   :  { %v710_v58 = vrot.slane %v698_v56, 6  ;;  %v709_v61 = vsel %vm382_vm7, %v708_v55, %v707_v57 }
 0x538   :  { %v834_v50 = vpop.permute.xlu1 %833 }
 0x539   :  { %v711_v62 = vsel %vm385_vm8, %v710_v58, %v709_v61  ;;  %v3698_v52 = vsel %vm699_vm15, %v834_v50, %v3578_v42 }
 0x53a   :  { %712 = vrot.lane.b32.xlu0 %v711_v62, %s3283_s29  ;;  %v939_v55 = vrot.slane %v3698_v52, 6  ;;  %v940_v56 = vrot.slane %v3698_v52, 7  ;;  %v941_v42 = vrot.slane %v3698_v52, 1 }
 0x5ac   :  { %v713_v41 = vpop.permute.xlu0 %712 }
 0x5ad   :  { %v715_v44 = vsel %vm699_vm15, %v713_v41, 0.0  ;;  %v3629_v47 = vsel %vm699_vm15, %v713_v41, %v3502_v10 }
 0x5ae   :  { %2957 = vmatmul.mubr.msk.f32.vlgmr.msra.gmra.mxu0 %vm201_vm13, %v715_v44  ;;  %2968 = vmatmul.mubr.msk.f32.vlgmr.msra.gmra.mxu1 %vm201_vm13, %v3629_v47 }
 0x5af   :  { %2971 = vmatpush3.msra.mxu0 %v3465_v13  ;;  %2982 = vmatpush3.msra.mxu1 %v3342_v3 }
 0x5b0   :  { %2972 = vmatprep.subr.mxu0 %v3279_v2  ;;  %2983 = vmatprep.subr.mxu1 %v3279_v2 }
 0x5b1   :  { %2973 = vmatpush3.msra.mxu0 %v3467_v14  ;;  %2984 = vmatpush3.msra.mxu1 %v3351_v5 }
 0x5b2   :  { %2974 = vmatprep.subr.mxu0 %v3279_v2  ;;  %2985 = vmatprep.subr.mxu1 %v3279_v2 }
 0x5b3   :  { %2975 = vmatpush3.msra.mxu0 %v3471_v17  ;;  %2986 = vmatpush3.msra.mxu1 %v3363_v7 }
 0x5b4   :  { %2987 = vmatprep.subr.mxu1 %v3279_v2  ;;  %2976 = vmatprep.subr.mxu0 %v3279_v2 }
 0x5b5   :  { %2977 = vmatpush3.msra.mxu0 %v3484_v31  ;;  %2978 = vmatprep.mubr.msk.f32.mxu0 %vm3280_vm2, %v3279_v2 }
 0x5b6   :  { %2988 = vmatpush3.msra.mxu1 %v3375_v9  ;;  %2989 = vmatprep.mubr.msk.f32.mxu1 %vm3280_vm2, %v3279_v2 }
 0x5b7   :  { %2992 = vmatprep.subr.mxu0 %v3279_v2  ;;  %3003 = vmatprep.subr.mxu1 %v3279_v2 }
 0x66e   :  { %v785_v10 = vpop.f32.mrf.mxu0  ;;  %v906_v49 = vpop.f32.mrf.mxu1 }
 0x66f   :  { %v786_v63 = vadd.f32 %v3531_v59, %v785_v10  ;;  %v911_v0 = vrot.slane %v906_v49, 6  ;;  %v912_v1 = vrot.slane %v906_v49, 7  ;;  %v913_v4 = vrot.slane %v906_v49, 1 }
 0x670   :  { %v920_v6 = vadd.f32 %v906_v49, %v3410_v21  ;;  %v2958_v8 = vpop.f32.mrf.mxu0  ;;  %v2969_v11 = vpop.f32.mrf.mxu1 }
 0x671   :  { %v796_v12 = vrot.slane %v786_v63, %v3533_v60  ;;  %v918_v16 = vadd.f32 %v911_v0, %v3400_v15  ;;  %v919_v19 = vadd.f32 %v912_v1, %v3408_v20  ;;  %v921_v22 = vadd.f32 %v913_v4, %v3406_v18 }
 0x672   :  { %v924_v24 = vmul.f32 %v920_v6, %v3414_v23 }
 0x673   :  { %v797_v25 = vcombine.high %v796_v12, %v796_v12  ;;  %v804_v26 = vrot.slane %v796_v12, %v3533_v60  ;;  %2796 = vst.sshfl [vmem:[%s4352_s7 + $0x1] sm:$0x1 pattern:$0x73625140] %v796_v12  ;;  %v922_v27 = vmul.f32 %v918_v16, %v3414_v23  ;;  %v923_v28 = vmul.f32 %v919_v19, %v3414_v23 }
 0x674   :  { %v925_v29 = vmul.f32 %v921_v22, %v3414_v23  ;;  %3134 = vtanh.f32 %v924_v24 }
 0x675   :  { %v811_v30 = vrot.slane %v797_v25, %v3533_v60  ;;  %v812_v32 = vcombine.high %v804_v26, %v804_v26  ;;  %2797 = vst.sshfl [vmem:[%s4352_s7 + $0x9] sm:$0x1 pattern:$0x73625140] %v797_v25  ;;  %3136 = vtanh.f32 %v922_v27 }
 0x676   :  { %3138 = vtanh.f32 %v923_v28 }
 0x677   :  { %v813_v33 = vcombine.high %v811_v30, %v811_v30  ;;  %820 = vst [vmem:[%s4352_s7 + $0x11] sm:$0x1] %v812_v32  ;;  %3140 = vtanh.f32 %v925_v29 }
 0x679   :  { %821 = vst [vmem:[%s4352_s7 + $0x19] sm:$0x1] %v813_v33 }
 0x681   :  { %v3135_v34 = vpop.eup %3134 }
 0x682   :  { %v3137_v35 = vpop.eup %3136  ;;  %v932_v48 = vmul.f32 %v3135_v34, %v3414_v23 }
 0x683   :  { %v3139_v36 = vpop.eup %3138  ;;  %v930_v37 = vmul.f32 %v3137_v35, %v3414_v23 }
 0x684   :  { %v3141_v39 = vpop.eup %3140  ;;  %v931_v40 = vmul.f32 %v3139_v36, %v3414_v23  ;;  %v3701_v53 = vadd.f32 %v932_v48, %v3426_v38 }
 0x685   :  { %v3681_v43 = vadd.f32 %v930_v37, %v3426_v38  ;;  %v933_v46 = vmul.f32 %v3141_v39, %v3414_v23 }
 0x686   :  { %v3685_v45 = vadd.f32 %v931_v40, %v3426_v38 }
 0x687   :  { %962 = vrot.lane.b32.xlu0 %v3681_v43, %s3282_s4  ;;  %v3693_v51 = vadd.f32 %v933_v46, %v3426_v38 }
 0x688   :  { %964 = vrot.lane.b32.xlu1 %v3685_v45, %s3282_s4 }
 0x68b   :  { %968 = vrot.lane.b32.xlu0 %v3693_v51, %s3282_s4 }
 0x68c   :  { %966 = vrot.lane.b32.xlu1 %v3701_v53, %s3282_s4 }
 0x68f   :  { %942 = vrot.lane.b32.xlu0 %v939_v55, %s3283_s29 }
 0x690   :  { %944 = vrot.lane.b32.xlu1 %v940_v56, %s3283_s29 }
 0x693   :  { %948 = vrot.lane.b32.xlu0 %v941_v42, %s3283_s29 }
 0x694   :  { %946 = vrot.lane.b32.xlu1 %v3698_v52, %s3283_s29 }
 0x6f9   :  { %v963_v57 = vpop.permute.xlu0 %962 }
 0x6fa   :  { %v965_v58 = vpop.permute.xlu1 %964  ;;  %v974_v61 = vmul.f32 %v963_v57, %v3681_v43 }
 0x6fb   :  { %v975_v62 = vmul.f32 %v965_v58, %v3685_v45 }
 0x6fc   :  { %982 = vrot.lane.b32.xlu1 %v974_v61, %s3283_s29 }
 0x6fd   :  { %984 = vrot.lane.b32.xlu0 %v975_v62, %s3283_s29  ;;  %v969_v41 = vpop.permute.xlu0 %968 }
 0x6fe   :  { %v967_v44 = vpop.permute.xlu1 %966  ;;  %v977_v10 = vmul.f32 %v969_v41, %v3693_v51 }
 0x6ff   :  { %v976_v49 = vmul.f32 %v967_v44, %v3701_v53 }
 0x701   :  { %986 = vrot.lane.b32.xlu1 %v976_v49, %s3283_s29  ;;  %988 = vrot.lane.b32.xlu0 %v977_v10, %s3283_s29  ;;  %v943_v0 = vpop.permute.xlu0 %942 }
 0x702   :  { %v945_v63 = vpop.permute.xlu1 %944  ;;  %v954_v6 = vmul.f32 %v943_v0, %v3681_v43 }
 0x703   :  { %v955_v8 = vmul.f32 %v945_v63, %v3685_v45 }
 0x705   :  { %v949_v4 = vpop.permute.xlu0 %948 }
 0x706   :  { %v947_v1 = vpop.permute.xlu1 %946  ;;  %v957_v24 = vmul.f32 %v949_v4, %v3693_v51 }
 0x707   :  { %v956_v22 = vmul.f32 %v947_v1, %v3701_v53 }
 0x76e   :  { %v983_v11 = vpop.permute.xlu1 %982 }
 0x76f   :  { %v994_v12 = vadd.f32 %v983_v11, %v954_v6  ;;  %v985_v16 = vpop.permute.xlu0 %984 }
 0x770   :  { %v995_v19 = vadd.f32 %v985_v16, %v955_v8 }
 0x771   :  { %3142 = vtanh.f32 %v994_v12  ;;  %v1150_v29 = vrot.slane %v994_v12, 2 }
 0x772   :  { %3144 = vtanh.f32 %v995_v19  ;;  %v1151_v30 = vrot.slane %v995_v19, 1 }
 0x773   :  { %v987_v25 = vpop.permute.xlu1 %986  ;;  %v989_v26 = vpop.permute.xlu0 %988 }
 0x774   :  { %v996_v27 = vadd.f32 %v987_v25, %v956_v22  ;;  %v997_v28 = vadd.f32 %v989_v26, %v957_v24  ;;  %v1152_v34 = vsel %vm379_vm6, %v1151_v30, %v1150_v29 }
 0x776   :  { %3146 = vtanh.f32 %v996_v27  ;;  %v1154_v36 = vrot.slane %v997_v28, 7  ;;  %v1153_v39 = vsel %vm382_vm7, %v996_v27, %v1152_v34 }
 0x777   :  { %3148 = vtanh.f32 %v997_v28 }
 0x778   :  { %v1155_v40 = vsel %vm385_vm8, %v1154_v36, %v1153_v39 }
 0x77e   :  { %v3143_v32 = vpop.eup %3142 }
 0x77f   :  { %v3145_v33 = vpop.eup %3144  ;;  %1006 = vrot.lane.b32.xlu0 %v3143_v32, %s3282_s4 }
 0x780   :  { %1008 = vrot.lane.b32.xlu1 %v3145_v33, %s3282_s4 }
 0x783   :  { %v3147_v35 = vpop.eup %3146 }
 0x784   :  { %v3149_v37 = vpop.eup %3148  ;;  %1010 = vrot.lane.b32.xlu1 %v3147_v35, %s3282_s4 }
 0x785   :  { %1012 = vrot.lane.b32.xlu0 %v3149_v37, %s3282_s4 }
 0x788   :  { %1156 = vrot.lane.b32.xlu1 %v1155_v40, %s3284_s30 }
 0x7f1   :  { %v1007_v46 = vpop.permute.xlu0 %1006 }
 0x7f2   :  { %v1009_v48 = vpop.permute.xlu1 %1008  ;;  %v1018_v50 = vmul.f32 %v1007_v46, %v3681_v43 }
 0x7f3   :  { %v1019_v55 = vmul.f32 %v1009_v48, %v3685_v45 }
 0x7f4   :  { %v1029_v56 = vrot.slane %v1018_v50, 2 }
 0x7f5   :  { %v1030_v42 = vrot.slane %v1019_v55, 1 }
 0x7f6   :  { %v1011_v57 = vpop.permute.xlu1 %1010 }
 0x7f7   :  { %v1031_v58 = vsel %vm379_vm6, %v1030_v42, %v1029_v56  ;;  %v1020_v61 = vmul.f32 %v1011_v57, %v3701_v53  ;;  %v1013_v62 = vpop.permute.xlu0 %1012 }
 0x7f8   :  { %v1021_v41 = vmul.f32 %v1013_v62, %v3693_v51 }
 0x7f9   :  { %v1032_v44 = vsel %vm382_vm7, %v1020_v61, %v1031_v58 }
 0x7fa   :  { %v1033_v10 = vrot.slane %v1021_v41, 7  ;;  %v1157_v46 = vpop.permute.xlu1 %1156 }
 0x7fb   :  { %v3818_v50 = vsel %vm1022_vm0, %v1157_v46, %v3698_v52 }
 0x7fc   :  { %v1034_v49 = vsel %vm385_vm8, %v1033_v10, %v1032_v44  ;;  %v1262_v56 = vrot.slane %v3818_v50, 5  ;;  %v1263_v42 = vrot.slane %v3818_v50, 6  ;;  %v1264_v52 = vrot.slane %v3818_v50, 7 }
 0x7fd   :  { %1035 = vrot.lane.b32.xlu0 %v1034_v49, %s3283_s29 }
 0x86f   :  { %v1036_v43 = vpop.permute.xlu0 %1035 }
 0x870   :  { %v1038_v45 = vsel %vm1022_vm0, %v1036_v43, 0.0  ;;  %v3749_v53 = vsel %vm1022_vm0, %v1036_v43, %v3629_v47 }
 0x871   :  { %2979 = vmatmul.mubr.msk.f32.vlgmr.msra.gmra.mxu0 %vm201_vm13, %v1038_v45  ;;  %2990 = vmatmul.mubr.msk.f32.vlgmr.msra.gmra.mxu1 %vm201_vm13, %v3749_v53 }
 0x872   :  { %2993 = vmatpush3.msra.mxu0 %v3465_v13  ;;  %3004 = vmatpush3.msra.mxu1 %v3342_v3 }
 0x873   :  { %2994 = vmatprep.subr.mxu0 %v3279_v2  ;;  %3005 = vmatprep.subr.mxu1 %v3279_v2 }
 0x874   :  { %2995 = vmatpush3.msra.mxu0 %v3467_v14  ;;  %3006 = vmatpush3.msra.mxu1 %v3351_v5 }
 0x875   :  { %2996 = vmatprep.subr.mxu0 %v3279_v2  ;;  %3007 = vmatprep.subr.mxu1 %v3279_v2 }
 0x876   :  { %2997 = vmatpush3.msra.mxu0 %v3471_v17  ;;  %3008 = vmatpush3.msra.mxu1 %v3363_v7 }
 0x877   :  { %3009 = vmatprep.subr.mxu1 %v3279_v2  ;;  %2998 = vmatprep.subr.mxu0 %v3279_v2 }
 0x878   :  { %2999 = vmatpush3.msra.mxu0 %v3484_v31  ;;  %3000 = vmatprep.mubr.msk.f32.mxu0 %vm3280_vm2, %v3279_v2 }
 0x879   :  { %3010 = vmatpush3.msra.mxu1 %v3375_v9  ;;  %3011 = vmatprep.mubr.msk.f32.mxu1 %vm3280_vm2, %v3279_v2 }
 0x87a   :  { %3014 = vmatprep.subr.mxu0 %v3279_v2  ;;  %3025 = vmatprep.subr.mxu1 %v3279_v2 }
 0x931   :  { %v1108_v3 = vpop.f32.mrf.mxu0  ;;  %v1229_v5 = vpop.f32.mrf.mxu1 }
 0x932   :  { %v1109_v7 = vadd.f32 %v3531_v59, %v1108_v3  ;;  %v1234_v47 = vrot.slane %v1229_v5, 5  ;;  %v1235_v51 = vrot.slane %v1229_v5, 6  ;;  %v1236_v63 = vrot.slane %v1229_v5, 7 }
 0x933   :  { %v1244_v0 = vadd.f32 %v1229_v5, %v3406_v18  ;;  %v2980_v1 = vpop.f32.mrf.mxu0  ;;  %v2991_v4 = vpop.f32.mrf.mxu1 }
 0x934   :  { %v1119_v9 = vrot.slane %v1109_v7, %v3533_v60  ;;  %v1241_v6 = vadd.f32 %v1234_v47, %v3400_v15  ;;  %v1242_v8 = vadd.f32 %v1235_v51, %v3408_v20  ;;  %v1243_v11 = vadd.f32 %v1236_v63, %v3410_v21 }
 0x935   :  { %v1248_v12 = vmul.f32 %v1244_v0, %v3414_v23 }
 0x936   :  { %v1120_v16 = vcombine.high %v1119_v9, %v1119_v9  ;;  %v1127_v19 = vrot.slane %v1119_v9, %v3533_v60  ;;  %2800 = vst.sshfl [vmem:[%s4352_s7 + $0x2] sm:$0x1 pattern:$0x73625140] %v1119_v9  ;;  %v1245_v22 = vmul.f32 %v1241_v6, %v3414_v23  ;;  %v1246_v24 = vmul.f32 %v1242_v8, %v3414_v23 }
 0x937   :  { %v1247_v25 = vmul.f32 %v1243_v11, %v3414_v23  ;;  %3150 = vtanh.f32 %v1248_v12 }
 0x938   :  { %v1134_v26 = vrot.slane %v1120_v16, %v3533_v60  ;;  %v1135_v27 = vcombine.high %v1127_v19, %v1127_v19  ;;  %2801 = vst.sshfl [vmem:[%s4352_s7 + $0xa] sm:$0x1 pattern:$0x73625140] %v1120_v16  ;;  %3152 = vtanh.f32 %v1245_v22 }
 0x939   :  { %3154 = vtanh.f32 %v1246_v24 }
 0x93a   :  { %v1136_v28 = vcombine.high %v1134_v26, %v1134_v26  ;;  %1143 = vst [vmem:[%s4352_s7 + $0x12] sm:$0x1] %v1135_v27  ;;  %3156 = vtanh.f32 %v1247_v25 }
 0x93c   :  { %1144 = vst [vmem:[%s4352_s7 + $0x1a] sm:$0x1] %v1136_v28 }
 0x944   :  { %v3151_v29 = vpop.eup %3150 }
 0x945   :  { %v3153_v30 = vpop.eup %3152  ;;  %v1256_v40 = vmul.f32 %v3151_v29, %v3414_v23 }
 0x946   :  { %v3155_v32 = vpop.eup %3154  ;;  %v1253_v33 = vmul.f32 %v3153_v30, %v3414_v23 }
 0x947   :  { %v3157_v34 = vpop.eup %3156  ;;  %v1254_v35 = vmul.f32 %v3155_v32, %v3414_v23  ;;  %v3821_v55 = vadd.f32 %v1256_v40, %v3426_v38 }
 0x948   :  { %v3801_v36 = vadd.f32 %v1253_v33, %v3426_v38  ;;  %v1255_v37 = vmul.f32 %v3157_v34, %v3414_v23 }
 0x949   :  { %v3805_v39 = vadd.f32 %v1254_v35, %v3426_v38 }
 0x94a   :  { %1285 = vrot.lane.b32.xlu0 %v3801_v36, %s3282_s4  ;;  %v3813_v48 = vadd.f32 %v1255_v37, %v3426_v38 }
 0x94b   :  { %1287 = vrot.lane.b32.xlu1 %v3805_v39, %s3282_s4 }
 0x94e   :  { %1289 = vrot.lane.b32.xlu0 %v3813_v48, %s3282_s4 }
 0x94f   :  { %1291 = vrot.lane.b32.xlu1 %v3821_v55, %s3282_s4 }
 0x952   :  { %1265 = vrot.lane.b32.xlu0 %v1262_v56, %s3283_s29 }
 0x953   :  { %1267 = vrot.lane.b32.xlu1 %v1263_v42, %s3283_s29 }
 0x956   :  { %1269 = vrot.lane.b32.xlu0 %v1264_v52, %s3283_s29 }
 0x9bc   :  { %v1286_v57 = vpop.permute.xlu0 %1285 }
 0x9bd   :  { %v1288_v58 = vpop.permute.xlu1 %1287  ;;  %v1297_v61 = vmul.f32 %v1286_v57, %v3801_v36 }
 0x9be   :  { %v1298_v62 = vmul.f32 %v1288_v58, %v3805_v39 }
 0x9bf   :  { %1305 = vrot.lane.b32.xlu1 %v1297_v61, %s3283_s29 }
 0x9c0   :  { %1307 = vrot.lane.b32.xlu0 %v1298_v62, %s3283_s29  ;;  %v1290_v41 = vpop.permute.xlu0 %1289 }
 0x9c1   :  { %v1299_v44 = vmul.f32 %v1290_v41, %v3813_v48  ;;  %v1292_v10 = vpop.permute.xlu1 %1291 }
 0x9c2   :  { %v1300_v49 = vmul.f32 %v1292_v10, %v3821_v55 }
 0x9c3   :  { %1309 = vrot.lane.b32.xlu1 %v1299_v44, %s3283_s29 }
 0x9c4   :  { %1271 = vrot.lane.b32.xlu0 %v3818_v50, %s3283_s29  ;;  %v1266_v43 = vpop.permute.xlu0 %1265 }
 0x9c5   :  { %v1268_v45 = vpop.permute.xlu1 %1267  ;;  %v1277_v5 = vmul.f32 %v1266_v43, %v3801_v36 }
 0x9c6   :  { %v1278_v7 = vmul.f32 %v1268_v45, %v3805_v39 }
 0x9c7   :  { %1311 = vrot.lane.b32.xlu1 %v1300_v49, %s3283_s29 }
 0x9c8   :  { %v1270_v3 = vpop.permute.xlu0 %1269 }
 0x9c9   :  { %v1279_v1 = vmul.f32 %v1270_v3, %v3813_v48 }
 0xa31   :  { %v1306_v47 = vpop.permute.xlu1 %1305 }
 0xa32   :  { %v1317_v51 = vadd.f32 %v1306_v47, %v1277_v5  ;;  %v1308_v63 = vpop.permute.xlu0 %1307 }
 0xa33   :  { %v1318_v0 = vadd.f32 %v1308_v63, %v1278_v7 }
 0xa34   :  { %3158 = vtanh.f32 %v1317_v51  ;;  %v1473_v24 = vrot.slane %v1317_v51, 3 }
 0xa35   :  { %3160 = vtanh.f32 %v1318_v0  ;;  %v1310_v4 = vpop.permute.xlu1 %1309  ;;  %v1474_v25 = vrot.slane %v1318_v0, 2 }
 0xa36   :  { %v1319_v9 = vadd.f32 %v1310_v4, %v1279_v1  ;;  %v1272_v6 = vpop.permute.xlu0 %1271 }
 0xa37   :  { %v1280_v8 = vmul.f32 %v1272_v6, %v3821_v55  ;;  %v1475_v28 = vsel %vm379_vm6, %v1474_v25, %v1473_v24 }
 0xa38   :  { %3162 = vtanh.f32 %v1319_v9  ;;  %v1476_v26 = vrot.slane %v1319_v9, 1 }
 0xa39   :  { %v1312_v11 = vpop.permute.xlu1 %1311 }
 0xa3a   :  { %v1320_v12 = vadd.f32 %v1312_v11, %v1280_v8  ;;  %v1477_v29 = vsel %vm382_vm7, %v1476_v26, %v1475_v28 }
 0xa3c   :  { %3164 = vtanh.f32 %v1320_v12  ;;  %v1478_v30 = vsel %vm385_vm8, %v1320_v12, %v1477_v29 }
 0xa41   :  { %v3159_v16 = vpop.eup %3158 }
 0xa42   :  { %v3161_v19 = vpop.eup %3160  ;;  %1329 = vrot.lane.b32.xlu0 %v3159_v16, %s3282_s4 }
 0xa43   :  { %1331 = vrot.lane.b32.xlu1 %v3161_v19, %s3282_s4 }
 0xa45   :  { %v3163_v22 = vpop.eup %3162 }
 0xa46   :  { %1333 = vrot.lane.b32.xlu0 %v3163_v22, %s3282_s4 }
 0xa49   :  { %v3165_v27 = vpop.eup %3164 }
 0xa4a   :  { %1335 = vrot.lane.b32.xlu1 %v3165_v27, %s3282_s4 }
 0xa4e   :  { %1479 = vrot.lane.b32.xlu1 %v1478_v30, %s3284_s30 }
 0xab4   :  { %v1330_v32 = vpop.permute.xlu0 %1329 }
 0xab5   :  { %v1332_v33 = vpop.permute.xlu1 %1331  ;;  %v1341_v34 = vmul.f32 %v1330_v32, %v3801_v36 }
 0xab6   :  { %v1342_v35 = vmul.f32 %v1332_v33, %v3805_v39 }
 0xab7   :  { %v1352_v40 = vrot.slane %v1341_v34, 3 }
 0xab8   :  { %v1353_v37 = vrot.slane %v1342_v35, 2  ;;  %v1334_v46 = vpop.permute.xlu0 %1333 }
 0xab9   :  { %v1343_v56 = vmul.f32 %v1334_v46, %v3813_v48 }
 0xaba   :  { %v1354_v52 = vsel %vm379_vm6, %v1353_v37, %v1352_v40 }
 0xabb   :  { %v1355_v42 = vrot.slane %v1343_v56, 1 }
 0xabc   :  { %v1336_v57 = vpop.permute.xlu1 %1335 }
 0xabd   :  { %v1344_v58 = vmul.f32 %v1336_v57, %v3821_v55  ;;  %v1356_v61 = vsel %vm382_vm7, %v1355_v42, %v1354_v52  ;;  %v3878_v55 = vld [vmem:[%s4348_s3 + $0x18] sm:$0xff] }
 0xabf   :  { %v1357_v62 = vsel %vm385_vm8, %v1344_v58, %v1356_v61 }
 0xac0   :  { %1358 = vrot.lane.b32.xlu0 %v1357_v62, %s3283_s29  ;;  %v1480_v32 = vpop.permute.xlu1 %1479 }
 0xac1   :  { %v3958_v34 = vsel %vm1345_vm1, %v1480_v32, %v3818_v50 }
 0xac2   :  { %v1586_v37 = vrot.slane %v3958_v34, 4  ;;  %v1587_v40 = vrot.slane %v3958_v34, 5  ;;  %v1588_v50 = vrot.slane %v3958_v34, 6  ;;  %v1589_v46 = vrot.slane %v3958_v34, 7 }
 0xb32   :  { %v1359_v36 = vpop.permute.xlu0 %1358 }
 0xb33   :  { %v1361_v39 = vsel %vm1345_vm1, %v1359_v36, 0.0  ;;  %v3869_v48 = vsel %vm1345_vm1, %v1359_v36, %v3749_v53  ;;  %v3887_v53 = vld [vmem:[%s4348_s3 + $0x10] sm:$0xff] }
 0xb34   :  { %3001 = vmatmul.mubr.msk.f32.vlgmr.msra.gmra.mxu0 %vm201_vm13, %v1361_v39  ;;  %3012 = vmatmul.mubr.msk.f32.vlgmr.msra.gmra.mxu1 %vm201_vm13, %v3869_v48 }
 0xb35   :  { %3015 = vmatpush3.msra.mxu0 %v3465_v13  ;;  %3026 = vmatpush3.msra.mxu1 %v3878_v55  ;;  %v3896_v13 = vld [vmem:[%s4348_s3 + $0x8] sm:$0xff] }
 0xb36   :  { %3016 = vmatprep.subr.mxu0 %v3279_v2  ;;  %3027 = vmatprep.subr.mxu1 %v3279_v2 }
 0xb37   :  { %3017 = vmatpush3.msra.mxu0 %v3467_v14  ;;  %3028 = vmatpush3.msra.mxu1 %v3887_v53  ;;  %v3907_v14 = vld [vmem:[%s4348_s3] sm:$0xff] }
 0xb38   :  { %3018 = vmatprep.subr.mxu0 %v3279_v2  ;;  %3029 = vmatprep.subr.mxu1 %v3279_v2 }
 0xb39   :  { %3019 = vmatpush3.msra.mxu0 %v3471_v17  ;;  %3030 = vmatpush3.msra.mxu1 %v3896_v13 }
 0xb3a   :  { %3031 = vmatprep.subr.mxu1 %v3279_v2  ;;  %3020 = vmatprep.subr.mxu0 %v3279_v2 }
 0xb3b   :  { %3021 = vmatpush3.msra.mxu0 %v3484_v31  ;;  %3022 = vmatprep.mubr.msk.f32.mxu0 %vm3280_vm2, %v3279_v2 }
 0xb3c   :  { %3032 = vmatpush3.msra.mxu1 %v3907_v14  ;;  %3033 = vmatprep.mubr.msk.f32.mxu1 %vm3280_vm2, %v3279_v2 }
 0xb3d   :  { %3036 = vmatprep.subr.mxu0 %v3279_v2  ;;  %3047 = vmatprep.subr.mxu1 %v3279_v2 }
 0xbf4   :  { %v1431_v17 = vpop.f32.mrf.mxu0  ;;  %v1552_v41 = vpop.f32.mrf.mxu1 }
 0xbf5   :  { %v1432_v31 = vadd.f32 %v3531_v59, %v1431_v17  ;;  %v1557_v44 = vrot.slane %v1552_v41, 4  ;;  %v1558_v10 = vrot.slane %v1552_v41, 5  ;;  %v1559_v49 = vrot.slane %v1552_v41, 6 }
 0xbf6   :  { %v1560_v43 = vrot.slane %v1552_v41, 7  ;;  %v3002_v45 = vpop.f32.mrf.mxu0  ;;  %v3013_v3 = vpop.f32.mrf.mxu1 }
 0xbf7   :  { %v1442_v5 = vrot.slane %v1432_v31, %v3533_v60  ;;  %v1565_v7 = vadd.f32 %v1557_v44, %v3400_v15  ;;  %v1566_v47 = vadd.f32 %v1558_v10, %v3408_v20  ;;  %v1567_v51 = vadd.f32 %v1559_v49, %v3410_v21 }
 0xbf8   :  { %v1568_v63 = vadd.f32 %v1560_v43, %v3406_v18 }
 0xbf9   :  { %v1443_v0 = vcombine.high %v1442_v5, %v1442_v5  ;;  %v1450_v1 = vrot.slane %v1442_v5, %v3533_v60  ;;  %2804 = vst.sshfl [vmem:[%s4352_s7 + $0x3] sm:$0x1 pattern:$0x73625140] %v1442_v5  ;;  %v1569_v59 = vmul.f32 %v1565_v7, %v3414_v23  ;;  %v1570_v4 = vmul.f32 %v1566_v47, %v3414_v23 }
 0xbfa   :  { %v1571_v9 = vmul.f32 %v1567_v51, %v3414_v23  ;;  %v1572_v6 = vmul.f32 %v1568_v63, %v3414_v23 }
 0xbfb   :  { %v1457_v8 = vrot.slane %v1443_v0, %v3533_v60  ;;  %v1458_v11 = vcombine.high %v1450_v1, %v1450_v1  ;;  %2805 = vst.sshfl [vmem:[%s4352_s7 + $0xb] sm:$0x1 pattern:$0x73625140] %v1443_v0  ;;  %3166 = vtanh.f32 %v1569_v59 }
 0xbfc   :  { %3168 = vtanh.f32 %v1570_v4 }
 0xbfd   :  { %v1459_v12 = vcombine.high %v1457_v8, %v1457_v8  ;;  %1466 = vst [vmem:[%s4352_s7 + $0x13] sm:$0x1] %v1458_v11  ;;  %3170 = vtanh.f32 %v1571_v9 }
 0xbfe   :  { %3172 = vtanh.f32 %v1572_v6 }
 0xbff   :  { %1467 = vst [vmem:[%s4352_s7 + $0x1b] sm:$0x1] %v1459_v12 }
 0xc08   :  { %v3167_v16 = vpop.eup %3166 }
 0xc09   :  { %v3169_v19 = vpop.eup %3168  ;;  %v1577_v22 = vmul.f32 %v3167_v16, %v3414_v23 }
 0xc0a   :  { %v3171_v24 = vpop.eup %3170  ;;  %v1578_v25 = vmul.f32 %v3169_v19, %v3414_v23 }
 0xc0b   :  { %v3173_v26 = vpop.eup %3172  ;;  %v3941_v27 = vadd.f32 %v1577_v22, %v3426_v38  ;;  %v1579_v28 = vmul.f32 %v3171_v24, %v3414_v23 }
 0xc0c   :  { %v3945_v29 = vadd.f32 %v1578_v25, %v3426_v38  ;;  %v1580_v30 = vmul.f32 %v3173_v26, %v3414_v23 }
 0xc0d   :  { %1610 = vrot.lane.b32.xlu0 %v3941_v27, %s3282_s4  ;;  %v3953_v33 = vadd.f32 %v1579_v28, %v3426_v38 }
 0xc0e   :  { %1612 = vrot.lane.b32.xlu1 %v3945_v29, %s3282_s4  ;;  %v3961_v35 = vadd.f32 %v1580_v30, %v3426_v38 }
 0xc11   :  { %1614 = vrot.lane.b32.xlu0 %v3953_v33, %s3282_s4 }
 0xc12   :  { %1616 = vrot.lane.b32.xlu1 %v3961_v35, %s3282_s4 }
 0xc15   :  { %1590 = vrot.lane.b32.xlu0 %v1586_v37, %s3283_s29 }
 0xc16   :  { %1592 = vrot.lane.b32.xlu1 %v1587_v40, %s3283_s29 }
 0xc19   :  { %1594 = vrot.lane.b32.xlu0 %v1588_v50, %s3283_s29 }
 0xc1a   :  { %1596 = vrot.lane.b32.xlu1 %v1589_v46, %s3283_s29 }
 0xc7f   :  { %v1611_v56 = vpop.permute.xlu0 %1610 }
 0xc80   :  { %v1613_v42 = vpop.permute.xlu1 %1612  ;;  %v1622_v52 = vmul.f32 %v1611_v56, %v3941_v27 }
 0xc81   :  { %v1623_v57 = vmul.f32 %v1613_v42, %v3945_v29 }
 0xc82   :  { %1630 = vrot.lane.b32.xlu0 %v1622_v52, %s3283_s29 }
 0xc83   :  { %1632 = vrot.lane.b32.xlu1 %v1623_v57, %s3283_s29  ;;  %v1615_v58 = vpop.permute.xlu0 %1614 }
 0xc84   :  { %v1617_v61 = vpop.permute.xlu1 %1616  ;;  %v1624_v62 = vmul.f32 %v1615_v58, %v3953_v33 }
 0xc85   :  { %v1625_v36 = vmul.f32 %v1617_v61, %v3961_v35  ;;  %v4020_v61 = vld [vmem:[#allocation5 + $0x10] sm:$0xff] }
 0xc86   :  { %1634 = vrot.lane.b32.xlu0 %v1624_v62, %s3283_s29  ;;  %v4032_v62 = vld [vmem:[#allocation5] sm:$0xff] }
 0xc87   :  { %1636 = vrot.lane.b32.xlu1 %v1625_v36, %s3283_s29  ;;  %v1591_v39 = vpop.permute.xlu0 %1590 }
 0xc88   :  { %v1593_v17 = vpop.permute.xlu1 %1592  ;;  %v1602_v44 = vmul.f32 %v1591_v39, %v3941_v27 }
 0xc89   :  { %v1603_v10 = vmul.f32 %v1593_v17, %v3945_v29  ;;  %v4045_v17 = vld [vmem:[%s4351_s6] ss:$0 sm:$0xff] }
 0xc8b   :  { %v1595_v41 = vpop.permute.xlu0 %1594 }
 0xc8c   :  { %v1597_v31 = vpop.permute.xlu1 %1596  ;;  %v1604_v5 = vmul.f32 %v1595_v41, %v3953_v33 }
 0xc8d   :  { %v1605_v7 = vmul.f32 %v1597_v31, %v3961_v35 }
 0xcf4   :  { %v1631_v49 = vpop.permute.xlu0 %1630 }
 0xcf5   :  { %v1633_v43 = vpop.permute.xlu1 %1632  ;;  %v1642_v45 = vadd.f32 %v1631_v49, %v1602_v44 }
 0xcf6   :  { %v1643_v3 = vadd.f32 %v1633_v43, %v1603_v10 }
 0xcf7   :  { %3174 = vtanh.f32 %v1642_v45  ;;  %v1799_v9 = vrot.slane %v1642_v45, 4 }
 0xcf8   :  { %3176 = vtanh.f32 %v1643_v3  ;;  %v1635_v47 = vpop.permute.xlu0 %1634  ;;  %v1800_v4 = vrot.slane %v1643_v3, 3 }
 0xcf9   :  { %v1637_v51 = vpop.permute.xlu1 %1636  ;;  %v1644_v63 = vadd.f32 %v1635_v47, %v1604_v5 }
 0xcfa   :  { %v1645_v0 = vadd.f32 %v1637_v51, %v1605_v7  ;;  %v1801_v16 = vsel %vm379_vm6, %v1800_v4, %v1799_v9 }
 0xcfb   :  { %3178 = vtanh.f32 %v1644_v63  ;;  %v1802_v6 = vrot.slane %v1644_v63, 2 }
 0xcfc   :  { %3180 = vtanh.f32 %v1645_v0  ;;  %v1804_v12 = vrot.slane %v1645_v0, 1 }
 0xcfd   :  { %v1803_v19 = vsel %vm382_vm7, %v1802_v6, %v1801_v16 }
 0xcfe   :  { %v1805_v22 = vsel %vm385_vm8, %v1804_v12, %v1803_v19 }
 0xd04   :  { %v3175_v1 = vpop.eup %3174 }
 0xd05   :  { %v3177_v59 = vpop.eup %3176  ;;  %1654 = vrot.lane.b32.xlu0 %v3175_v1, %s3282_s4 }
 0xd06   :  { %1656 = vrot.lane.b32.xlu1 %v3177_v59, %s3282_s4 }
 0xd08   :  { %v3179_v8 = vpop.eup %3178 }
 0xd09   :  { %v3181_v11 = vpop.eup %3180  ;;  %1658 = vrot.lane.b32.xlu0 %v3179_v8, %s3282_s4 }
 0xd0a   :  { %1660 = vrot.lane.b32.xlu1 %v3181_v11, %s3282_s4 }
 0xd0e   :  { %1806 = vrot.lane.b32.xlu1 %v1805_v22, %s3284_s30 }
 0xd77   :  { %v1655_v24 = vpop.permute.xlu0 %1654 }
 0xd78   :  { %v1657_v25 = vpop.permute.xlu1 %1656  ;;  %v1666_v26 = vmul.f32 %v1655_v24, %v3941_v27 }
 0xd79   :  { %v1667_v28 = vmul.f32 %v1657_v25, %v3945_v29 }
 0xd7a   :  { %v1677_v32 = vrot.slane %v1666_v26, 4 }
 0xd7b   :  { %v1678_v30 = vrot.slane %v1667_v28, 3  ;;  %v1659_v37 = vpop.permute.xlu0 %1658 }
 0xd7c   :  { %v1661_v40 = vpop.permute.xlu1 %1660  ;;  %v1668_v50 = vmul.f32 %v1659_v37, %v3953_v33 }
 0xd7d   :  { %v1669_v46 = vmul.f32 %v1661_v40, %v3961_v35  ;;  %v1679_v42 = vsel %vm379_vm6, %v1678_v30, %v1677_v32  ;;  %v4014_v35 = vld [vmem:[#allocation5 + $0x18] sm:$0xff] }
 0xd7e   :  { %v1680_v56 = vrot.slane %v1668_v50, 2 }
 0xd7f   :  { %v1682_v52 = vrot.slane %v1669_v46, 1 }
 0xd80   :  { %v1681_v57 = vsel %vm382_vm7, %v1680_v56, %v1679_v42  ;;  %v1807_v37 = vpop.permute.xlu1 %1806 }
 0xd81   :  { %v1683_v58 = vsel %vm385_vm8, %v1682_v52, %v1681_v57  ;;  %v4091_v50 = vsel %vm1670_vm3, %v1807_v37, %v3958_v34 }
 0xd82   :  { %1684 = vrot.lane.b32.xlu0 %v1683_v58, %s3283_s29  ;;  %v1913_v56 = vrot.slane %v4091_v50, 3  ;;  %v1914_v42 = vrot.slane %v4091_v50, 4  ;;  %v1915_v34 = vrot.slane %v4091_v50, 5  ;;  %v1916_v52 = vrot.slane %v4091_v50, 6 }
 0xdf4   :  { %v1685_v27 = vpop.permute.xlu0 %1684 }
 0xdf5   :  { %v1687_v29 = vsel %vm1670_vm3, %v1685_v27, 0.0  ;;  %v4009_v33 = vsel %vm1670_vm3, %v1685_v27, %v3869_v48  ;;  %v4026_v48 = vld [vmem:[#allocation5 + $0x8] sm:$0xff] }
 0xdf6   :  { %3023 = vmatmul.mubr.msk.f32.vlgmr.msra.gmra.mxu0 %vm201_vm13, %v1687_v29  ;;  %3034 = vmatmul.mubr.msk.f32.vlgmr.msra.gmra.mxu1 %vm201_vm13, %v4009_v33 }
 0xdf7   :  { %3037 = vmatpush3.msra.mxu0 %v4014_v35  ;;  %3048 = vmatpush3.msra.mxu1 %v3878_v55 }
 0xdf8   :  { %3038 = vmatprep.subr.mxu0 %v3279_v2  ;;  %3049 = vmatprep.subr.mxu1 %v3279_v2 }
 0xdf9   :  { %3039 = vmatpush3.msra.mxu0 %v4020_v61  ;;  %3050 = vmatpush3.msra.mxu1 %v3887_v53 }
 0xdfa   :  { %3040 = vmatprep.subr.mxu0 %v3279_v2  ;;  %3051 = vmatprep.subr.mxu1 %v3279_v2 }
 0xdfb   :  { %3041 = vmatpush3.msra.mxu0 %v4026_v48  ;;  %3052 = vmatpush3.msra.mxu1 %v3896_v13 }
 0xdfc   :  { %3053 = vmatprep.subr.mxu1 %v3279_v2  ;;  %3042 = vmatprep.subr.mxu0 %v3279_v2 }
 0xdfd   :  { %3043 = vmatpush3.msra.mxu0 %v4032_v62  ;;  %3044 = vmatprep.mubr.msk.f32.mxu0 %vm3280_vm2, %v3279_v2 }
 0xdfe   :  { %3054 = vmatpush3.msra.mxu1 %v3907_v14  ;;  %3055 = vmatprep.mubr.msk.f32.mxu1 %vm3280_vm2, %v3279_v2 }
 0xdff   :  { %3058 = vmatprep.subr.mxu0 %v3279_v2  ;;  %3069 = vmatprep.subr.mxu1 %v3279_v2 }
 0xeb6   :  { %v1757_v36 = vpop.f32.mrf.mxu0  ;;  %v1879_v39 = vpop.f32.mrf.mxu1 }
 0xeb7   :  { %v1758_v41 = vadd.f32 %v4045_v17, %v1757_v36  ;;  %v1884_v31 = vrot.slane %v1879_v39, 3  ;;  %v1885_v44 = vrot.slane %v1879_v39, 4  ;;  %v1886_v10 = vrot.slane %v1879_v39, 5 }
 0xeb8   :  { %v1887_v49 = vrot.slane %v1879_v39, 6  ;;  %v3024_v43 = vpop.f32.mrf.mxu0  ;;  %v3035_v45 = vpop.f32.mrf.mxu1 }
 0xeb9   :  { %v1768_v3 = vrot.slane %v1758_v41, %v3533_v60  ;;  %v1892_v5 = vadd.f32 %v1884_v31, %v3400_v15  ;;  %v1893_v7 = vadd.f32 %v1885_v44, %v3408_v20  ;;  %v1894_v47 = vadd.f32 %v1886_v10, %v3410_v21 }
 0xeba   :  { %v1895_v51 = vadd.f32 %v1887_v49, %v3406_v18 }
 0xebb   :  { %v1769_v63 = vcombine.high %v1768_v3, %v1768_v3  ;;  %v1776_v0 = vrot.slane %v1768_v3, %v3533_v60  ;;  %2808 = vst.sshfl [vmem:[%s4352_s7 + $0x4] sm:$0x1 pattern:$0x73625140] %v1768_v3  ;;  %v1896_v1 = vmul.f32 %v1892_v5, %v3414_v23  ;;  %v1897_v59 = vmul.f32 %v1893_v7, %v3414_v23 }
 0xebc   :  { %v1898_v4 = vmul.f32 %v1894_v47, %v3414_v23  ;;  %v1899_v9 = vmul.f32 %v1895_v51, %v3414_v23 }
 0xebd   :  { %v1783_v6 = vrot.slane %v1769_v63, %v3533_v60  ;;  %v1784_v8 = vcombine.high %v1776_v0, %v1776_v0  ;;  %2809 = vst.sshfl [vmem:[%s4352_s7 + $0xc] sm:$0x1 pattern:$0x73625140] %v1769_v63  ;;  %3182 = vtanh.f32 %v1896_v1 }
 0xebe   :  { %3184 = vtanh.f32 %v1897_v59 }
 0xebf   :  { %v1785_v11 = vcombine.high %v1783_v6, %v1783_v6  ;;  %1792 = vst [vmem:[%s4352_s7 + $0x14] sm:$0x1] %v1784_v8  ;;  %3186 = vtanh.f32 %v1898_v4 }
 0xec0   :  { %3188 = vtanh.f32 %v1899_v9 }
 0xec1   :  { %1793 = vst [vmem:[%s4352_s7 + $0x1c] sm:$0x1] %v1785_v11 }
 0xeca   :  { %v3183_v12 = vpop.eup %3182 }
 0xecb   :  { %v3185_v16 = vpop.eup %3184  ;;  %v1904_v19 = vmul.f32 %v3183_v12, %v3414_v23 }
 0xecc   :  { %v3187_v22 = vpop.eup %3186  ;;  %v1905_v24 = vmul.f32 %v3185_v16, %v3414_v23 }
 0xecd   :  { %v3189_v25 = vpop.eup %3188  ;;  %v4074_v26 = vadd.f32 %v1904_v19, %v3426_v38  ;;  %v1906_v28 = vmul.f32 %v3187_v22, %v3414_v23 }
 0xece   :  { %v4078_v30 = vadd.f32 %v1905_v24, %v3426_v38  ;;  %v1907_v32 = vmul.f32 %v3189_v25, %v3414_v23 }
 0xecf   :  { %1937 = vrot.lane.b32.xlu0 %v4074_v26, %s3282_s4  ;;  %v4086_v40 = vadd.f32 %v1906_v28, %v3426_v38 }
 0xed0   :  { %1939 = vrot.lane.b32.xlu1 %v4078_v30, %s3282_s4  ;;  %v4094_v46 = vadd.f32 %v1907_v32, %v3426_v38 }
 0xed3   :  { %1941 = vrot.lane.b32.xlu0 %v4086_v40, %s3282_s4 }
 0xed4   :  { %1943 = vrot.lane.b32.xlu1 %v4094_v46, %s3282_s4 }
 0xed7   :  { %1917 = vrot.lane.b32.xlu0 %v1913_v56, %s3283_s29 }
 0xed8   :  { %1919 = vrot.lane.b32.xlu1 %v1914_v42, %s3283_s29 }
 0xedb   :  { %1921 = vrot.lane.b32.xlu0 %v1915_v34, %s3283_s29 }
 0xedc   :  { %1923 = vrot.lane.b32.xlu1 %v1916_v52, %s3283_s29 }
 0xf41   :  { %v1938_v57 = vpop.permute.xlu0 %1937 }
 0xf42   :  { %v1940_v58 = vpop.permute.xlu1 %1939  ;;  %v1949_v27 = vmul.f32 %v1938_v57, %v4074_v26 }
 0xf43   :  { %v1950_v29 = vmul.f32 %v1940_v58, %v4078_v30 }
 0xf44   :  { %1957 = vrot.lane.b32.xlu0 %v1949_v27, %s3283_s29 }
 0xf45   :  { %1959 = vrot.lane.b32.xlu1 %v1950_v29, %s3283_s29  ;;  %v1942_v36 = vpop.permute.xlu0 %1941 }
 0xf46   :  { %v1944_v39 = vpop.permute.xlu1 %1943  ;;  %v1951_v41 = vmul.f32 %v1942_v36, %v4086_v40 }
 0xf47   :  { %v1952_v31 = vmul.f32 %v1944_v39, %v4094_v46 }
 0xf48   :  { %1961 = vrot.lane.b32.xlu0 %v1951_v41, %s3283_s29 }
 0xf49   :  { %1963 = vrot.lane.b32.xlu1 %v1952_v31, %s3283_s29  ;;  %v1918_v44 = vpop.permute.xlu0 %1917 }
 0xf4a   :  { %v1920_v10 = vpop.permute.xlu1 %1919  ;;  %v1929_v45 = vmul.f32 %v1918_v44, %v4074_v26 }
 0xf4b   :  { %v1930_v3 = vmul.f32 %v1920_v10, %v4078_v30 }
 0xf4d   :  { %v1922_v49 = vpop.permute.xlu0 %1921 }
 0xf4e   :  { %v1924_v43 = vpop.permute.xlu1 %1923  ;;  %v1931_v63 = vmul.f32 %v1922_v49, %v4086_v40 }
 0xf4f   :  { %v1932_v0 = vmul.f32 %v1924_v43, %v4094_v46 }
 0xfb6   :  { %v1958_v5 = vpop.permute.xlu0 %1957 }
 0xfb7   :  { %v1960_v7 = vpop.permute.xlu1 %1959  ;;  %v1969_v47 = vadd.f32 %v1958_v5, %v1929_v45 }
 0xfb8   :  { %v1970_v51 = vadd.f32 %v1960_v7, %v1930_v3 }
 0xfb9   :  { %3190 = vtanh.f32 %v1969_v47  ;;  %v2126_v12 = vrot.slane %v1969_v47, 5 }
 0xfba   :  { %3192 = vtanh.f32 %v1970_v51  ;;  %v1962_v1 = vpop.permute.xlu0 %1961  ;;  %v2127_v11 = vrot.slane %v1970_v51, 4 }
 0xfbb   :  { %v1964_v59 = vpop.permute.xlu1 %1963  ;;  %v1971_v4 = vadd.f32 %v1962_v1, %v1931_v63 }
 0xfbc   :  { %v1972_v9 = vadd.f32 %v1964_v59, %v1932_v0  ;;  %v2128_v24 = vsel %vm379_vm6, %v2127_v11, %v2126_v12 }
 0xfbd   :  { %3194 = vtanh.f32 %v1971_v4  ;;  %v2129_v16 = vrot.slane %v1971_v4, 3 }
 0xfbe   :  { %3196 = vtanh.f32 %v1972_v9  ;;  %v2131_v25 = vrot.slane %v1972_v9, 2 }
 0xfbf   :  { %v2130_v28 = vsel %vm382_vm7, %v2129_v16, %v2128_v24 }
 0xfc0   :  { %v2132_v32 = vsel %vm385_vm8, %v2131_v25, %v2130_v28 }
 0xfc6   :  { %v3191_v6 = vpop.eup %3190 }
 0xfc7   :  { %v3193_v8 = vpop.eup %3192  ;;  %1981 = vrot.lane.b32.xlu0 %v3191_v6, %s3282_s4 }
 0xfc8   :  { %1983 = vrot.lane.b32.xlu1 %v3193_v8, %s3282_s4 }
 0xfca   :  { %v3195_v19 = vpop.eup %3194 }
 0xfcb   :  { %v3197_v22 = vpop.eup %3196  ;;  %1985 = vrot.lane.b32.xlu0 %v3195_v19, %s3282_s4 }
 0xfcc   :  { %1987 = vrot.lane.b32.xlu1 %v3197_v22, %s3282_s4 }
 0xfd0   :  { %2133 = vrot.lane.b32.xlu1 %v2132_v32, %s3284_s30 }
0x1039   :  { %v1982_v37 = vpop.permute.xlu0 %1981 }
0x103a   :  { %v1984_v56 = vpop.permute.xlu1 %1983  ;;  %v1993_v42 = vmul.f32 %v1982_v37, %v4074_v26 }
0x103b   :  { %v1994_v34 = vmul.f32 %v1984_v56, %v4078_v30 }
0x103c   :  { %v2004_v57 = vrot.slane %v1993_v42, 5 }
0x103d   :  { %v2005_v52 = vrot.slane %v1994_v34, 4  ;;  %v1986_v58 = vpop.permute.xlu0 %1985 }
0x103e   :  { %v1988_v27 = vpop.permute.xlu1 %1987  ;;  %v1995_v29 = vmul.f32 %v1986_v58, %v4086_v40 }
0x103f   :  { %v1996_v36 = vmul.f32 %v1988_v27, %v4094_v46  ;;  %v2006_v41 = vsel %vm379_vm6, %v2005_v52, %v2004_v57 }
0x1040   :  { %v2007_v39 = vrot.slane %v1995_v29, 3 }
0x1041   :  { %v2009_v31 = vrot.slane %v1996_v36, 2 }
0x1042   :  { %v2008_v44 = vsel %vm382_vm7, %v2007_v39, %v2006_v41  ;;  %v2134_v42 = vpop.permute.xlu1 %2133 }
0x1043   :  { %v2010_v10 = vsel %vm385_vm8, %v2009_v31, %v2008_v44  ;;  %v4210_v52 = vsel %vm1997_vm4, %v2134_v42, %v4091_v50 }
0x1044   :  { %2011 = vrot.lane.b32.xlu0 %v2010_v10, %s3283_s29  ;;  %v2240_v58 = vrot.slane %v4210_v52, 2  ;;  %v2241_v27 = vrot.slane %v4210_v52, 3  ;;  %v2242_v50 = vrot.slane %v4210_v52, 4  ;;  %v2243_v29 = vrot.slane %v4210_v52, 5 }
0x10b6   :  { %v2012_v26 = vpop.permute.xlu0 %2011 }
0x10b7   :  { %v2014_v30 = vsel %vm1997_vm4, %v2012_v26, 0.0  ;;  %v4142_v40 = vsel %vm1997_vm4, %v2012_v26, %v4009_v33 }
0x10b8   :  { %3045 = vmatmul.mubr.msk.f32.vlgmr.msra.gmra.mxu0 %vm201_vm13, %v2014_v30  ;;  %3056 = vmatmul.mubr.msk.f32.vlgmr.msra.gmra.mxu1 %vm201_vm13, %v4142_v40 }
0x10b9   :  { %3059 = vmatpush3.msra.mxu0 %v4014_v35  ;;  %3070 = vmatpush3.msra.mxu1 %v3878_v55 }
0x10ba   :  { %3060 = vmatprep.subr.mxu0 %v3279_v2  ;;  %3071 = vmatprep.subr.mxu1 %v3279_v2 }
0x10bb   :  { %3061 = vmatpush3.msra.mxu0 %v4020_v61  ;;  %3072 = vmatpush3.msra.mxu1 %v3887_v53 }
0x10bc   :  { %3062 = vmatprep.subr.mxu0 %v3279_v2  ;;  %3073 = vmatprep.subr.mxu1 %v3279_v2 }
0x10bd   :  { %3063 = vmatpush3.msra.mxu0 %v4026_v48  ;;  %3074 = vmatpush3.msra.mxu1 %v3896_v13 }
0x10be   :  { %3075 = vmatprep.subr.mxu1 %v3279_v2  ;;  %3064 = vmatprep.subr.mxu0 %v3279_v2 }
0x10bf   :  { %3065 = vmatpush3.msra.mxu0 %v4032_v62  ;;  %3066 = vmatprep.mubr.msk.f32.mxu0 %vm3280_vm2, %v3279_v2 }
0x10c0   :  { %3076 = vmatpush3.msra.mxu1 %v3907_v14  ;;  %3077 = vmatprep.mubr.msk.f32.mxu1 %vm3280_vm2, %v3279_v2 }
0x10c1   :  { %3080 = vmatprep.subr.mxu0 %v3279_v2 }
0x1178   :  { %v2084_v55 = vpop.f32.mrf.mxu0  ;;  %v2206_v53 = vpop.f32.mrf.mxu1 }
0x1179   :  { %v2085_v13 = vadd.f32 %v4045_v17, %v2084_v55  ;;  %v2211_v33 = vrot.slane %v2206_v53, 2  ;;  %v2212_v46 = vrot.slane %v2206_v53, 3  ;;  %v2213_v49 = vrot.slane %v2206_v53, 4 }
0x117a   :  { %v2214_v43 = vrot.slane %v2206_v53, 5  ;;  %v3046_v45 = vpop.f32.mrf.mxu0  ;;  %v3057_v3 = vpop.f32.mrf.mxu1 }
0x117b   :  { %v2095_v5 = vrot.slane %v2085_v13, %v3533_v60  ;;  %v2219_v7 = vadd.f32 %v2211_v33, %v3400_v15  ;;  %v2220_v14 = vadd.f32 %v2212_v46, %v3408_v20  ;;  %v2221_v47 = vadd.f32 %v2213_v49, %v3410_v21 }
0x117c   :  { %v2222_v51 = vadd.f32 %v2214_v43, %v3406_v18 }
0x117d   :  { %v2096_v63 = vcombine.high %v2095_v5, %v2095_v5  ;;  %v2103_v0 = vrot.slane %v2095_v5, %v3533_v60  ;;  %2812 = vst.sshfl [vmem:[%s4352_s7 + $0x5] sm:$0x1 pattern:$0x73625140] %v2095_v5  ;;  %v2223_v1 = vmul.f32 %v2219_v7, %v3414_v23  ;;  %v2224_v59 = vmul.f32 %v2220_v14, %v3414_v23 }
0x117e   :  { %v2225_v4 = vmul.f32 %v2221_v47, %v3414_v23  ;;  %v2226_v9 = vmul.f32 %v2222_v51, %v3414_v23 }
0x117f   :  { %v2110_v6 = vrot.slane %v2096_v63, %v3533_v60  ;;  %v2111_v8 = vcombine.high %v2103_v0, %v2103_v0  ;;  %2813 = vst.sshfl [vmem:[%s4352_s7 + $0xd] sm:$0x1 pattern:$0x73625140] %v2096_v63  ;;  %3198 = vtanh.f32 %v2223_v1 }
0x1180   :  { %3200 = vtanh.f32 %v2224_v59 }
0x1181   :  { %v2112_v11 = vcombine.high %v2110_v6, %v2110_v6  ;;  %2119 = vst [vmem:[%s4352_s7 + $0x15] sm:$0x1] %v2111_v8  ;;  %3202 = vtanh.f32 %v2225_v4 }
0x1182   :  { %3204 = vtanh.f32 %v2226_v9 }
0x1183   :  { %2120 = vst [vmem:[%s4352_s7 + $0x1d] sm:$0x1] %v2112_v11 }
0x118c   :  { %v3199_v12 = vpop.eup %3198 }
0x118d   :  { %v3201_v16 = vpop.eup %3200  ;;  %v2231_v19 = vmul.f32 %v3199_v12, %v3414_v23 }
0x118e   :  { %v3203_v22 = vpop.eup %3202  ;;  %v2232_v24 = vmul.f32 %v3201_v16, %v3414_v23 }
0x118f   :  { %v3205_v25 = vpop.eup %3204  ;;  %v4193_v28 = vadd.f32 %v2231_v19, %v3426_v38  ;;  %v2233_v32 = vmul.f32 %v3203_v22, %v3414_v23 }
0x1190   :  { %v4197_v37 = vadd.f32 %v2232_v24, %v3426_v38  ;;  %v2234_v56 = vmul.f32 %v3205_v25, %v3414_v23 }
0x1191   :  { %2264 = vrot.lane.b32.xlu0 %v4193_v28, %s3282_s4  ;;  %v4205_v34 = vadd.f32 %v2233_v32, %v3426_v38 }
0x1192   :  { %2266 = vrot.lane.b32.xlu1 %v4197_v37, %s3282_s4  ;;  %v4213_v57 = vadd.f32 %v2234_v56, %v3426_v38 }
0x1195   :  { %2268 = vrot.lane.b32.xlu0 %v4205_v34, %s3282_s4 }
0x1196   :  { %2270 = vrot.lane.b32.xlu1 %v4213_v57, %s3282_s4 }
0x1199   :  { %2244 = vrot.lane.b32.xlu0 %v2240_v58, %s3283_s29 }
0x119a   :  { %2246 = vrot.lane.b32.xlu1 %v2241_v27, %s3283_s29 }
0x119d   :  { %2248 = vrot.lane.b32.xlu0 %v2242_v50, %s3283_s29 }
0x119e   :  { %2250 = vrot.lane.b32.xlu1 %v2243_v29, %s3283_s29 }
0x1203   :  { %v2265_v36 = vpop.permute.xlu0 %2264 }
0x1204   :  { %v2267_v39 = vpop.permute.xlu1 %2266  ;;  %v2276_v41 = vmul.f32 %v2265_v36, %v4193_v28 }
0x1205   :  { %v2277_v31 = vmul.f32 %v2267_v39, %v4197_v37 }
0x1206   :  { %2284 = vrot.lane.b32.xlu0 %v2276_v41, %s3283_s29 }
0x1207   :  { %2286 = vrot.lane.b32.xlu1 %v2277_v31, %s3283_s29  ;;  %v2269_v44 = vpop.permute.xlu0 %2268 }
0x1208   :  { %v2271_v10 = vpop.permute.xlu1 %2270  ;;  %v2278_v26 = vmul.f32 %v2269_v44, %v4205_v34 }
0x1209   :  { %v2279_v30 = vmul.f32 %v2271_v10, %v4213_v57 }
0x120a   :  { %2288 = vrot.lane.b32.xlu0 %v2278_v26, %s3283_s29 }
0x120b   :  { %2290 = vrot.lane.b32.xlu1 %v2279_v30, %s3283_s29  ;;  %v2245_v55 = vpop.permute.xlu0 %2244 }
0x120c   :  { %v2247_v53 = vpop.permute.xlu1 %2246  ;;  %v2256_v46 = vmul.f32 %v2245_v55, %v4193_v28 }
0x120d   :  { %v2257_v49 = vmul.f32 %v2247_v53, %v4197_v37 }
0x120f   :  { %v2249_v13 = vpop.permute.xlu0 %2248 }
0x1210   :  { %v2251_v33 = vpop.permute.xlu1 %2250  ;;  %v2258_v7 = vmul.f32 %v2249_v13, %v4205_v34 }
0x1211   :  { %v2259_v14 = vmul.f32 %v2251_v33, %v4213_v57 }
0x1278   :  { %v2285_v43 = vpop.permute.xlu0 %2284 }
0x1279   :  { %v2287_v45 = vpop.permute.xlu1 %2286  ;;  %v2296_v3 = vadd.f32 %v2285_v43, %v2256_v46 }
0x127a   :  { %v2297_v5 = vadd.f32 %v2287_v45, %v2257_v49 }
0x127b   :  { %3206 = vtanh.f32 %v2296_v3  ;;  %v2453_v9 = vrot.slane %v2296_v3, 6 }
0x127c   :  { %3208 = vtanh.f32 %v2297_v5  ;;  %v2289_v47 = vpop.permute.xlu0 %2288  ;;  %v2454_v4 = vrot.slane %v2297_v5, 5 }
0x127d   :  { %v2291_v51 = vpop.permute.xlu1 %2290  ;;  %v2298_v63 = vadd.f32 %v2289_v47, %v2258_v7 }
0x127e   :  { %v2299_v0 = vadd.f32 %v2291_v51, %v2259_v14  ;;  %v2455_v12 = vsel %vm379_vm6, %v2454_v4, %v2453_v9 }
0x127f   :  { %3210 = vtanh.f32 %v2298_v63  ;;  %v2456_v6 = vrot.slane %v2298_v63, 4 }
0x1280   :  { %3212 = vtanh.f32 %v2299_v0  ;;  %v2458_v16 = vrot.slane %v2299_v0, 3 }
0x1281   :  { %v2457_v19 = vsel %vm382_vm7, %v2456_v6, %v2455_v12 }
0x1282   :  { %v2459_v22 = vsel %vm385_vm8, %v2458_v16, %v2457_v19 }
0x1288   :  { %v3207_v1 = vpop.eup %3206 }
0x1289   :  { %v3209_v59 = vpop.eup %3208  ;;  %2308 = vrot.lane.b32.xlu0 %v3207_v1, %s3282_s4 }
0x128a   :  { %2310 = vrot.lane.b32.xlu1 %v3209_v59, %s3282_s4 }
0x128c   :  { %v3211_v8 = vpop.eup %3210 }
0x128d   :  { %v3213_v11 = vpop.eup %3212  ;;  %2312 = vrot.lane.b32.xlu0 %v3211_v8, %s3282_s4 }
0x128e   :  { %2314 = vrot.lane.b32.xlu1 %v3213_v11, %s3282_s4 }
0x1292   :  { %2460 = vrot.lane.b32.xlu1 %v2459_v22, %s3284_s30 }
0x12fb   :  { %v2309_v24 = vpop.permute.xlu0 %2308 }
0x12fc   :  { %v2311_v25 = vpop.permute.xlu1 %2310  ;;  %v2320_v32 = vmul.f32 %v2309_v24, %v4193_v28 }
0x12fd   :  { %v2321_v56 = vmul.f32 %v2311_v25, %v4197_v37 }
0x12fe   :  { %v2331_v58 = vrot.slane %v2320_v32, 6 }
0x12ff   :  { %v2332_v42 = vrot.slane %v2321_v56, 5  ;;  %v2313_v27 = vpop.permute.xlu0 %2312 }
0x1300   :  { %v2315_v50 = vpop.permute.xlu1 %2314  ;;  %v2322_v29 = vmul.f32 %v2313_v27, %v4205_v34 }
0x1301   :  { %v2323_v36 = vmul.f32 %v2315_v50, %v4213_v57  ;;  %v2333_v41 = vsel %vm379_vm6, %v2332_v42, %v2331_v58 }
0x1302   :  { %v2334_v39 = vrot.slane %v2322_v29, 4 }
0x1303   :  { %v2336_v31 = vrot.slane %v2323_v36, 3 }
0x1304   :  { %v2335_v44 = vsel %vm382_vm7, %v2334_v39, %v2333_v41  ;;  %v2461_v6 = vpop.permute.xlu1 %2460 }
0x1305   :  { %v2337_v10 = vsel %vm385_vm8, %v2336_v31, %v2335_v44  ;;  %v2463_v11 = vsel %vm2324_vm5, %v2461_v6, %v4210_v52 }
0x1306   :  { %2338 = vrot.lane.b32.xlu0 %v2337_v10, %s3283_s29  ;;  %v2567_v16 = vrot.slane %v2463_v11, 1  ;;  %v2568_v19 = vrot.slane %v2463_v11, 2  ;;  %v2570_v22 = vrot.slane %v2463_v11, 4 }
0x1378   :  { %v2339_v28 = vpop.permute.xlu0 %2338 }
0x1379   :  { %v2341_v37 = vsel %vm2324_vm5, %v2339_v28, 0.0  ;;  %v2448_v34 = vsel %vm2324_vm5, %v2339_v28, %v4142_v40 }
0x137a   :  { %3067 = vmatmul.mubr.msk.f32.vlgmr.msra.gmra.mxu0 %vm201_vm13, %v2341_v37  ;;  %3078 = vmatmul.mubr.msk.f32.vlgmr.msra.gmra.mxu1 %vm201_vm13, %v2448_v34 }
0x137b   :  { %3081 = vmatpush3.msra.mxu0 %v4014_v35  ;;  %3088 = vmatprep.mubr.msk.f32.mxu0 %vm3280_vm2, %v3279_v2  ;;  %vm2651_vm2 = vcmp.gt.s32.totalorder %v3497_v54, 7 }
0x137c   :  { %3082 = vmatprep.subr.mxu0 %v3279_v2 }
0x137d   :  { %3083 = vmatpush3.msra.mxu0 %v4020_v61 }
0x137e   :  { %3084 = vmatprep.subr.mxu0 %v3279_v2 }
0x137f   :  { %3085 = vmatpush3.msra.mxu0 %v4026_v48 }
0x1380   :  { %3086 = vmatprep.subr.mxu0 %v3279_v2 }
0x1381   :  { %3087 = vmatpush3.msra.mxu0 %v4032_v62 }
0x143a   :  { %v2411_v40 = vpop.f32.mrf.mxu0  ;;  %v2533_v57 = vpop.f32.mrf.mxu1 }
0x143b   :  { %v2412_v26 = vadd.f32 %v4045_v17, %v2411_v40  ;;  %v2538_v35 = vrot.slane %v2533_v57, 1  ;;  %v2539_v30 = vrot.slane %v2533_v57, 2  ;;  %v2540_v55 = vrot.slane %v2533_v57, 3 }
0x143c   :  { %v2541_v53 = vrot.slane %v2533_v57, 4  ;;  %v3068_v13 = vpop.f32.mrf.mxu0  ;;  %v3079_v33 = vpop.f32.mrf.mxu1 }
0x143d   :  { %v2422_v61 = vrot.slane %v2412_v26, %v3533_v60  ;;  %v2546_v46 = vadd.f32 %v2538_v35, %v3400_v15  ;;  %v2547_v48 = vadd.f32 %v2539_v30, %v3408_v20  ;;  %v2548_v2 = vadd.f32 %v2540_v55, %v3410_v21 }
0x143e   :  { %v2549_v62 = vadd.f32 %v2541_v53, %v3406_v18 }
0x143f   :  { %v2423_v49 = vcombine.high %v2422_v61, %v2422_v61  ;;  %v2430_v43 = vrot.slane %v2422_v61, %v3533_v60  ;;  %2816 = vst.sshfl [vmem:[%s4352_s7 + $0x6] sm:$0x1 pattern:$0x73625140] %v2422_v61  ;;  %v2550_v45 = vmul.f32 %v2546_v46, %v3414_v23  ;;  %v2551_v3 = vmul.f32 %v2547_v48, %v3414_v23 }
0x1440   :  { %v2552_v5 = vmul.f32 %v2548_v2, %v3414_v23  ;;  %v2553_v15 = vmul.f32 %v2549_v62, %v3414_v23 }
0x1441   :  { %v2437_v20 = vrot.slane %v2423_v49, %v3533_v60  ;;  %v2438_v21 = vcombine.high %v2430_v43, %v2430_v43  ;;  %2817 = vst.sshfl [vmem:[%s4352_s7 + $0xe] sm:$0x1 pattern:$0x73625140] %v2423_v49  ;;  %3214 = vtanh.f32 %v2550_v45 }
0x1442   :  { %3216 = vtanh.f32 %v2551_v3 }
0x1443   :  { %v2439_v18 = vcombine.high %v2437_v20, %v2437_v20  ;;  %2446 = vst [vmem:[%s4352_s7 + $0x16] sm:$0x1] %v2438_v21  ;;  %3218 = vtanh.f32 %v2552_v5 }
0x1444   :  { %3220 = vtanh.f32 %v2553_v15 }
0x1445   :  { %2447 = vst [vmem:[%s4352_s7 + $0x1e] sm:$0x1] %v2439_v18 }
0x144e   :  { %v3215_v7 = vpop.eup %3214 }
0x144f   :  { %v3217_v14 = vpop.eup %3216  ;;  %v2558_v47 = vmul.f32 %v3215_v7, %v3414_v23 }
0x1450   :  { %v3219_v51 = vpop.eup %3218  ;;  %v2559_v63 = vmul.f32 %v3217_v14, %v3414_v23 }
0x1451   :  { %v3221_v0 = vpop.eup %3220  ;;  %v2562_v1 = vadd.f32 %v2558_v47, %v3426_v38  ;;  %v2560_v59 = vmul.f32 %v3219_v51, %v3414_v23 }
0x1452   :  { %v2563_v4 = vadd.f32 %v2559_v63, %v3426_v38  ;;  %v2561_v9 = vmul.f32 %v3221_v0, %v3414_v23  ;;  %v2569_v23 = vrot.slane %v2463_v11, 3 }
0x1453   :  { %2591 = vrot.lane.b32.xlu0 %v2562_v1, %s3282_s4  ;;  %v2564_v8 = vadd.f32 %v2560_v59, %v3426_v38 }
0x1454   :  { %2593 = vrot.lane.b32.xlu1 %v2563_v4, %s3282_s4  ;;  %v2565_v12 = vadd.f32 %v2561_v9, %v3426_v38 }
0x1457   :  { %2595 = vrot.lane.b32.xlu0 %v2564_v8, %s3282_s4 }
0x1458   :  { %2597 = vrot.lane.b32.xlu1 %v2565_v12, %s3282_s4 }
0x145b   :  { %2571 = vrot.lane.b32.xlu0 %v2567_v16, %s3283_s29 }
0x145c   :  { %2573 = vrot.lane.b32.xlu1 %v2568_v19, %s3283_s29 }
0x145f   :  { %2575 = vrot.lane.b32.xlu0 %v2569_v23, %s3283_s29 }
0x1460   :  { %2577 = vrot.lane.b32.xlu1 %v2570_v22, %s3283_s29 }
0x14c5   :  { %v2592_v24 = vpop.permute.xlu0 %2591 }
0x14c6   :  { %v2594_v52 = vpop.permute.xlu1 %2593  ;;  %v2603_v25 = vmul.f32 %v2592_v24, %v2562_v1 }
0x14c7   :  { %v2604_v38 = vmul.f32 %v2594_v52, %v2563_v4 }
0x14c8   :  { %2611 = vrot.lane.b32.xlu0 %v2603_v25, %s3283_s29 }
0x14c9   :  { %2613 = vrot.lane.b32.xlu1 %v2604_v38, %s3283_s29  ;;  %v2596_v32 = vpop.permute.xlu0 %2595 }
0x14ca   :  { %v2598_v56 = vpop.permute.xlu1 %2597  ;;  %v2605_v42 = vmul.f32 %v2596_v32, %v2564_v8 }
0x14cb   :  { %v2606_v58 = vmul.f32 %v2598_v56, %v2565_v12 }
0x14cc   :  { %2615 = vrot.lane.b32.xlu0 %v2605_v42, %s3283_s29 }
0x14cd   :  { %2617 = vrot.lane.b32.xlu1 %v2606_v58, %s3283_s29  ;;  %v2572_v27 = vpop.permute.xlu0 %2571 }
0x14ce   :  { %v2574_v50 = vpop.permute.xlu1 %2573  ;;  %v2583_v39 = vmul.f32 %v2572_v27, %v2562_v1 }
0x14cf   :  { %v2584_v41 = vmul.f32 %v2574_v50, %v2563_v4 }
0x14d1   :  { %v2576_v29 = vpop.permute.xlu0 %2575 }
0x14d2   :  { %v2578_v36 = vpop.permute.xlu1 %2577  ;;  %v2585_v37 = vmul.f32 %v2576_v29, %v2564_v8 }
0x14d3   :  { %v2586_v34 = vmul.f32 %v2578_v36, %v2565_v12 }
0x153a   :  { %v2612_v31 = vpop.permute.xlu0 %2611 }
0x153b   :  { %v2614_v44 = vpop.permute.xlu1 %2613  ;;  %v2623_v10 = vadd.f32 %v2612_v31, %v2583_v39 }
0x153c   :  { %v2624_v28 = vadd.f32 %v2614_v44, %v2584_v41 }
0x153d   :  { %3222 = vtanh.f32 %v2623_v10 }
0x153e   :  { %3224 = vtanh.f32 %v2624_v28  ;;  %v2616_v40 = vpop.permute.xlu0 %2615 }
0x153f   :  { %v2618_v57 = vpop.permute.xlu1 %2617  ;;  %v2625_v26 = vadd.f32 %v2616_v40, %v2585_v37 }
0x1540   :  { %v2626_v35 = vadd.f32 %v2618_v57, %v2586_v34 }
0x1541   :  { %3226 = vtanh.f32 %v2625_v26 }
0x1542   :  { %3228 = vtanh.f32 %v2626_v35 }
0x154a   :  { %v3223_v30 = vpop.eup %3222 }
0x154b   :  { %v3225_v55 = vpop.eup %3224  ;;  %2635 = vrot.lane.b32.xlu0 %v3223_v30, %s3282_s4 }
0x154c   :  { %2637 = vrot.lane.b32.xlu1 %v3225_v55, %s3282_s4 }
0x154e   :  { %v3227_v53 = vpop.eup %3226 }
0x154f   :  { %v3229_v13 = vpop.eup %3228  ;;  %2639 = vrot.lane.b32.xlu0 %v3227_v53, %s3282_s4 }
0x1550   :  { %2641 = vrot.lane.b32.xlu1 %v3229_v13, %s3282_s4 }
0x15bd   :  { %v2636_v33 = vpop.permute.xlu0 %2635 }
0x15be   :  { %v2638_v61 = vpop.permute.xlu1 %2637  ;;  %v2647_v46 = vmul.f32 %v2636_v33, %v2562_v1 }
0x15bf   :  { %v2648_v48 = vmul.f32 %v2638_v61, %v2563_v4 }
0x15c0   :  { %v2658_v62 = vrot.slane %v2647_v46, 7 }
0x15c1   :  { %v2659_v2 = vrot.slane %v2648_v48, 6  ;;  %v2640_v49 = vpop.permute.xlu0 %2639 }
0x15c2   :  { %v2642_v43 = vpop.permute.xlu1 %2641  ;;  %v2649_v45 = vmul.f32 %v2640_v49, %v2564_v8 }
0x15c3   :  { %v2650_v3 = vmul.f32 %v2642_v43, %v2565_v12  ;;  %v2660_v15 = vsel %vm379_vm6, %v2659_v2, %v2658_v62 }
0x15c4   :  { %v2661_v5 = vrot.slane %v2649_v45, 5 }
0x15c5   :  { %v2663_v20 = vrot.slane %v2650_v3, 4 }
0x15c6   :  { %v2662_v21 = vsel %vm382_vm7, %v2661_v5, %v2660_v15 }
0x15c7   :  { %v2664_v18 = vsel %vm385_vm8, %v2663_v20, %v2662_v21 }
0x15c8   :  { %2665 = vrot.lane.b32.xlu0 %v2664_v18, %s3283_s29 }
0x163a   :  { %v2666_v7 = vpop.permute.xlu0 %2665 }
0x163b   :  { %v2668_v14 = vsel %vm2651_vm2, %v2666_v7, 0.0 }
0x163c   :  { %3089 = vmatmul.mubr.msk.f32.vlgmr.msra.gmra.mxu0 %vm201_vm13, %v2668_v14 }
0x16fc   :  { %v2738_v47 = vpop.f32.mrf.mxu0 }
0x16fd   :  { %v2739_v51 = vadd.f32 %v4045_v17, %v2738_v47 }
0x16fe   :  { %v3090_v63 = vpop.f32.mrf.mxu0 }
0x16ff   :  { %v2749_v0 = vrot.slane %v2739_v51, %v3533_v60 }
0x1701   :  { %v2750_v1 = vcombine.high %v2749_v0, %v2749_v0  ;;  %v2757_v59 = vrot.slane %v2749_v0, %v3533_v60  ;;  %2820 = vst.sshfl [vmem:[%s4352_s7 + $0x7] sm:$0x1 pattern:$0x73625140] %v2749_v0 }
0x1703   :  { %v2764_v4 = vrot.slane %v2750_v1, %v3533_v60  ;;  %v2765_v54 = vcombine.high %v2757_v59, %v2757_v59  ;;  %2821 = vst.sshfl [vmem:[%s4352_s7 + $0xf] sm:$0x1 pattern:$0x73625140] %v2750_v1 }
0x1705   :  { %v2766_v9 = vcombine.high %v2764_v4, %v2764_v4  ;;  %2773 = vst [vmem:[%s4352_s7 + $0x17] sm:$0x1] %v2765_v54 }
0x1707   :  { %2774 = vst [vmem:[%s4352_s7 + $0x1f] sm:$0x1] %v2766_v9 }
0x1708   :  { %2779 = vsyncpa [#allocation3], 1 }
0x1709   :  { %2780 = vsyncpa [#allocation4], 1 }

</bundles_post_ra>
